<compile_context>
chip_gen: v5e
topology: v5e:2x2
jax: 0.10.0
libtpu: 0.0.40
codegen_flags: <defaults>
</compile_context>

<pallas_src>
import functools

import jax
import jax.numpy as jnp
from jax.experimental import pallas as pl
from jax.experimental.pallas import tpu as pltpu


_LANES = 128
_SUBLANES = 8
_TILE_QUANTUM = 1024        # keeps every block's second-minor dim a multiple of 8
_NUM_CORES = 2              # v7x megacore split; just serializes on single-TC chips
_MAX_TILE_ROWS = 32768      # ~4 MiB per streamed input tile at D=32 f32


def _round_up(a, m):
    return -(-a // m) * m


def _block_diag(m, p):
    """Block-diagonal repeat of a small 2-D matrix, p times (wrapper-side, tiny)."""
    if p == 1:
        return m
    r, c = m.shape
    out = jnp.zeros((p * r, p * c), m.dtype)
    for g in range(p):
        out = out.at[g * r:(g + 1) * r, g * c:(g + 1) * c].set(m)
    return out


def _verification_loss_kernel(x0_ref, x1_ref, y_ref, w1_ref, b1_ref, w2_ref, b2_ref,
                              out_ref, *, tile, pack, tiles_per_core, n_rows):
    c = pl.program_id(0)            # megacore / "parallel" axis
    j = pl.program_id(1)            # streaming / reduction axis
    tp = tile // pack               # packed rows in this tile

    @pl.when(j == 0)
    def _init():
        out_ref[...] = jnp.zeros_like(out_ref)

    # |x0 - x1| on the packed layout                                   [tp, pack*D]
    d = jnp.abs(x0_ref[...] - x1_ref[...])

    # layer 1: block-diagonal W1 evaluates `pack` rows per MXU row     [tp, pack*H]
    h = jnp.dot(d, w1_ref[...], preferred_element_type=jnp.float32) + b1_ref[...]
    h = jnp.maximum(h, 0.0)

    # layer 2: grouped W2 -> one logit per original batch row          [tp, pack]
    s = jnp.dot(h, w2_ref[...], preferred_element_type=jnp.float32) + b2_ref[...]

    # BCEWithLogits (numerically stable): max(s,0) - s*y + log1p(exp(-|s|))
    y = y_ref[...]
    per = jnp.maximum(s, 0.0) - s * y + jnp.log1p(jnp.exp(-jnp.abs(s)))

    # Mask zero-padded rows (padding can span several tiles / both cores, so mask every step;
    # it is a couple of ops on tp/8 vregs — negligible vs the DMA window).
    gt = c * tiles_per_core + j
    q_idx = jax.lax.broadcasted_iota(jnp.int32, (tp, pack), 0)
    g_idx = jax.lax.broadcasted_iota(jnp.int32, (tp, pack), 1)
    row = (gt * tp + q_idx) * pack + g_idx
    per = jnp.where(row < n_rows, per, 0.0)

    # Sublane fold (metadata reshape + vreg adds) into the per-core resident output block.
    out_ref[...] += per.reshape(tp // _SUBLANES, _SUBLANES, pack).sum(axis=0)


def verification_loss(x0, x1, y, w1, b1, w2, b2, *, tile_rows=None):
    """x0, x1: [N, D]; y: [N] or [N, 1]; w1: [D, H]; b1: [H]; w2: [H, 1]; b2: [1]."""
    N, D = x0.shape
    H = w1.shape[1]
    assert x1.shape == (N, D) and w1.shape[0] == D and w2.shape[0] == H
    assert x0.shape[0] == x1.shape[0] == y.shape[0]

    x0 = x0.astype(jnp.float32)
    x1 = x1.astype(jnp.float32)
    # mimic: y = y.float(); unsqueeze(-1) — handled by flattening to one label per row
    y = y.astype(jnp.float32).reshape(N)

    # --- row packing ----------------------------------------------------------
    pack = _LANES // D if (D < _LANES and _LANES % D == 0) else 1

    itemsize = jnp.dtype(jnp.float32).itemsize
    lane_cols = _round_up(pack * D, _LANES)          # VMEM lane padding of streamed x tiles

    # --- generation-aware VMEM budget -> batch tile ---------------------------
    try:
        vmem_cap = int(pltpu.get_tpu_info().vmem_capacity_bytes)
    except Exception:
        vmem_cap = 64 * 1024 * 1024                  # conservative (v7x-sized) fallback
    budget = min(int(vmem_cap * 0.6), 48 * 1024 * 1024)   # ~38 MiB on v7x, 48 MiB v5e/v6e

    # VMEM bytes per ORIGINAL batch row: double-buffered x0/x1 + lane-padded double-buffered y.
    bytes_per_row = (2 * 2 * lane_cols * itemsize) // pack + (2 * _LANES * 4) // pack
    max_rows = max(_TILE_QUANTUM,
                   (budget // bytes_per_row) // _TILE_QUANTUM * _TILE_QUANTUM)
    max_rows = min(max_rows, _MAX_TILE_ROWS)

    per_core = -(-N // _NUM_CORES)
    want = _round_up(per_core, _TILE_QUANTUM)
    if tile_rows is not None:
        want = min(want, _round_up(int(tile_rows), _TILE_QUANTUM))
    tile = max(_TILE_QUANTUM, int(min(max_rows, want)))

    tiles_per_core = -(-per_core // tile)
    padded_n = _NUM_CORES * tiles_per_core * tile

    if padded_n != N:
        pad = padded_n - N
        x0 = jnp.pad(x0, ((0, pad), (0, 0)))
        x1 = jnp.pad(x1, ((0, pad), (0, 0)))
        y = jnp.pad(y, (0, pad))

    # Packed layouts: xp[q, g*D + k] = x[q*pack + g, k];  y2[q, g] = y[q*pack + g].
    x0p = x0.reshape(padded_n // pack, pack * D)
    x1p = x1.reshape(padded_n // pack, pack * D)
    y2 = y.reshape(padded_n // pack, pack)

    # Block-diagonal / grouped weights so one MXU pass evaluates `pack` rows.
    w1_k = _block_diag(w1.astype(jnp.float32), pack)                    # (pack*D, pack*H)
    w2_k = _block_diag(w2.reshape(H, 1).astype(jnp.float32), pack)      # (pack*H, pack)
    b1_k = jnp.tile(b1.reshape(1, H).astype(jnp.float32), (1, pack))    # (1, pack*H)
    b2_k = b2.reshape(1, 1).astype(jnp.float32)                         # (1, 1)

    tp = tile // pack
    tpc = tiles_per_core
    grid = (_NUM_CORES, tiles_per_core)

    # Explicit scoped-VMEM limit derived from the chosen tile (lane-padding accounted).
    working = (2 * 2 * tp * lane_cols * itemsize                 # x0, x1 double-buffered
               + 2 * tp * _LANES * 4                             # y (lane-padded) double-buffered
               + 4 * lane_cols * _round_up(pack * H, _LANES) * 4 # weights (padded, buffered)
               + 2 * _NUM_CORES * _SUBLANES * _LANES * 4         # output partials
               + (2 << 20))                                      # slack
    vmem_limit = int(min(max(working, 16 * 1024 * 1024), int(vmem_cap * 0.9)))

    kernel = functools.partial(
        _verification_loss_kernel,
        tile=tile, pack=pack, tiles_per_core=tiles_per_core, n_rows=N)

    partials = pl.pallas_call(
        kernel,
        out_shape=jax.ShapeDtypeStruct((_NUM_CORES * _SUBLANES, pack), jnp.float32),
        grid_spec=pltpu.PrefetchScalarGridSpec(
            num_scalar_prefetch=0,
            grid=grid,
            in_specs=[
                pl.BlockSpec((tp, pack * D), lambda c, j: (c * tpc + j, 0)),  # x0 (streamed)
                pl.BlockSpec((tp, pack * D), lambda c, j: (c * tpc + j, 0)),  # x1 (streamed)
                pl.BlockSpec((tp, pack), lambda c, j: (c * tpc + j, 0)),      # y  (streamed)
                pl.BlockSpec((pack * D, pack * H), lambda c, j: (0, 0)),      # W1 (resident)
                pl.BlockSpec((1, pack * H), lambda c, j: (0, 0)),             # b1 (resident)
                pl.BlockSpec((pack * H, pack), lambda c, j: (0, 0)),          # W2 (resident)
                pl.BlockSpec((1, 1), lambda c, j: (0, 0)),                    # b2 (resident)
            ],
            out_specs=pl.BlockSpec((_SUBLANES, pack), lambda c, j: (c, 0)),   # per-core partials
        ),
        compiler_params=pltpu.CompilerParams(
            dimension_semantics=("parallel", "arbitrary"),
            vmem_limit_bytes=vmem_limit),
        cost_estimate=pl.CostEstimate(
            flops=2 * N * pack * D * H + 2 * N * pack * H + 2 * N * D + 12 * N,
            transcendentals=2 * N,
            bytes_accessed=2 * padded_n * D * itemsize + padded_n * 4
                           + _NUM_CORES * _SUBLANES * pack * 4),
    )(x0p, x1p, y2, w1_k, b1_k, w2_k, b2_k)

    return jnp.sum(partials) * (1.0 / N)


def _reference_loss(x0, x1, y, w1, b1, w2, b2):
    y = y.astype(jnp.float32).reshape(-1, 1)
    d = jnp.abs(x0 - x1).astype(jnp.float32)
    h = jnp.maximum(d @ w1 + b1.reshape(1, -1), 0.0)
    s = h @ w2.reshape(w1.shape[1], 1) + b2.reshape(1, 1)
    per = jnp.maximum(s, 0.0) - s * y + jnp.log1p(jnp.exp(-jnp.abs(s)))
    return jnp.mean(per)


if __name__ == "__main__":
    key = jax.random.PRNGKey(0)
    D = 32                 # embedding_dim
    H = D // 2             # hidden_layer_sizes=[embedding_dim // 2]

    k0, k1, k2, k3, k4, k5, k6 = jax.random.split(key, 7)

    # PyTorch-Linear-style init U(-1/sqrt(fan_in), 1/sqrt(fan_in)), stored pre-transposed [in, out].
    lim1 = 1.0 / jnp.sqrt(jnp.float32(D))
    lim2 = 1.0 / jnp.sqrt(jnp.float32(H))
    w1 = jax.random.uniform(k3, (D, H), minval=-lim1, maxval=lim1, dtype=jnp.float32)
    b1 = jax.random.uniform(k4, (1, H), minval=-lim1, maxval=lim1, dtype=jnp.float32)
    w2 = jax.random.uniform(k5, (H, 1), minval=-lim2, maxval=lim2, dtype=jnp.float32)
    b2 = jax.random.uniform(k6, (1, 1), minval=-lim2, maxval=lim2, dtype=jnp.float32)

    # --- case 1: small batch (single tile per core, mostly-padded tail) ------
    N = 8
    x0 = jax.random.normal(k0, (N, D), dtype=jnp.float32)
    x1 = jax.random.normal(k1, (N, D), dtype=jnp.float32)
    y = (jax.random.uniform(k2, (N,)) > 0.5).astype(jnp.float32)

    loss = jax.block_until_ready(verification_loss(x0, x1, y, w1, b1, w2, b2))
    ref = _reference_loss(x0, x1, y, w1, b1, w2, b2)
    assert jnp.allclose(loss, ref, atol=2e-5, rtol=1e-5), (loss, ref)

    # --- case 2: multiple tiles per core + ragged tail + fully-padded tile ---
    N2 = 2500
    kk0, kk1, kk2 = jax.random.split(jax.random.PRNGKey(1), 3)
    x0b = jax.random.normal(kk0, (N2, D), dtype=jnp.float32)
    x1b = jax.random.normal(kk1, (N2, D), dtype=jnp.float32)
    yb = (jax.random.uniform(kk2, (N2,)) > 0.5).astype(jnp.float32)

    loss2 = jax.block_until_ready(
        verification_loss(x0b, x1b, yb, w1, b1, w2, b2, tile_rows=1024))
    ref2 = _reference_loss(x0b, x1b, yb, w1, b1, w2, b2)
    assert jnp.allclose(loss2, ref2, atol=2e-5, rtol=1e-5), (loss2, ref2)

    print("KERNEL_OK")
</pallas_src>

<mosaic_0001>
module attributes {stable_mosaic.version = 11 : i64} {
  func.func @_verification_loss_kernel(%arg0: i32, %arg1: i32, %arg2: memref<256x128xf32, #tpu.memory_space<vmem>>, %arg3: memref<256x128xf32, #tpu.memory_space<vmem>>, %arg4: memref<256x4xf32, #tpu.memory_space<vmem>>, %arg5: memref<128x64xf32, #tpu.memory_space<vmem>>, %arg6: memref<1x64xf32, #tpu.memory_space<vmem>>, %arg7: memref<64x4xf32, #tpu.memory_space<vmem>>, %arg8: memref<1x1xf32, #tpu.memory_space<vmem>>, %arg9: memref<8x4xf32, #tpu.memory_space<vmem>>) attributes {dimension_semantics = [#tpu.dimension_semantics<parallel>, #tpu.dimension_semantics<arbitrary>], iteration_bounds = array<i64: 2, 1>, scalar_prefetch = 0 : i64, scratch_operands = 0 : i64, tpu.core_type = #tpu.core_type<tc>, window_params = [{transform_indices = @transform_0, window_bounds = array<i64: 256, 128>}, {transform_indices = @transform_1, window_bounds = array<i64: 256, 128>}, {transform_indices = @transform_2, window_bounds = array<i64: 256, 4>}, {pipeline_mode = #tpu.pipeline_mode<synchronous>, transform_indices = @transform_3, window_bounds = array<i64: 128, 64>}, {pipeline_mode = #tpu.pipeline_mode<synchronous>, transform_indices = @transform_4, window_bounds = array<i64: 1, 64>}, {pipeline_mode = #tpu.pipeline_mode<synchronous>, transform_indices = @transform_5, window_bounds = array<i64: 64, 4>}, {pipeline_mode = #tpu.pipeline_mode<synchronous>, transform_indices = @transform_6, window_bounds = array<i64: 1, 1>}, {transform_indices = @transform_7, window_bounds = array<i64: 8, 4>}]} {
    %c0_i32 = arith.constant 0 : i32
    %0 = arith.cmpi eq, %arg1, %c0_i32 : i32
    %1 = arith.extui %0 : i1 to i32
    %c0_i32_0 = arith.constant 0 : i32
    %2 = arith.cmpi ne, %1, %c0_i32_0 : i32
    scf.if %2 {
      %cst_24 = arith.constant 0.000000e+00 : f32
      %49 = vector.broadcast %cst_24 : f32 to vector<8x4xf32>
      %c0_25 = arith.constant 0 : index
      %c0_26 = arith.constant 0 : index
      %50 = vector.load %arg9[%c0_25, %c0_26] : memref<8x4xf32, #tpu.memory_space<vmem>>, vector<8x4xf32>
      tpu.vector_store %arg9[%c0_25, %c0_26], %49 {strides = array<i32>} : memref<8x4xf32, #tpu.memory_space<vmem>>, vector<8x4xf32>,
    } else {
    }
    %c0 = arith.constant 0 : index
    %c0_1 = arith.constant 0 : index
    %3 = vector.load %arg2[%c0, %c0_1] : memref<256x128xf32, #tpu.memory_space<vmem>>, vector<256x128xf32>
    %c0_2 = arith.constant 0 : index
    %c0_3 = arith.constant 0 : index
    %4 = vector.load %arg3[%c0_2, %c0_3] : memref<256x128xf32, #tpu.memory_space<vmem>>, vector<256x128xf32>
    %5 = arith.subf %3, %4 : vector<256x128xf32>
    %6 = math.absf %5 : vector<256x128xf32>
    %c0_4 = arith.constant 0 : index
    %c0_5 = arith.constant 0 : index
    %7 = vector.load %arg5[%c0_4, %c0_5] : memref<128x64xf32, #tpu.memory_space<vmem>>, vector<128x64xf32>
    %cst = arith.constant dense<0.000000e+00> : vector<256x64xf32>
    %8 = tpu.matmul %6, %7, %cst {dimension_numbers = #tpu.dot_dimension_numbers<[1], [0], [0], [1], [0, 0, 1, 1], [], []>} : vector<256x128xf32>, vector<128x64xf32>, vector<256x64xf32> -> vector<256x64xf32>
    %c0_6 = arith.constant 0 : index
    %c0_7 = arith.constant 0 : index
    %9 = vector.load %arg6[%c0_6, %c0_7] : memref<1x64xf32, #tpu.memory_space<vmem>>, vector<1x64xf32>
    %10 = vector.broadcast %9 : vector<1x64xf32> to vector<256x64xf32>
    %11 = arith.addf %8, %10 : vector<256x64xf32>
    %cst_8 = arith.constant 0.000000e+00 : f32
    %12 = vector.broadcast %cst_8 : f32 to vector<256x64xf32>
    %13 = arith.maximumf %11, %12 : vector<256x64xf32>
    %c0_9 = arith.constant 0 : index
    %c0_10 = arith.constant 0 : index
    %14 = vector.load %arg7[%c0_9, %c0_10] : memref<64x4xf32, #tpu.memory_space<vmem>>, vector<64x4xf32>
    %cst_11 = arith.constant dense<0.000000e+00> : vector<256x4xf32>
    %15 = tpu.matmul %13, %14, %cst_11 {dimension_numbers = #tpu.dot_dimension_numbers<[1], [0], [0], [1], [0, 0, 1, 1], [], []>} : vector<256x64xf32>, vector<64x4xf32>, vector<256x4xf32> -> vector<256x4xf32>
    %c0_12 = arith.constant 0 : index
    %c0_13 = arith.constant 0 : index
    %16 = vector.load %arg8[%c0_12, %c0_13] : memref<1x1xf32, #tpu.memory_space<vmem>>, vector<1x1xf32>
    %17 = vector.broadcast %16 : vector<1x1xf32> to vector<256x4xf32>
    %18 = arith.addf %15, %17 : vector<256x4xf32>
    %c0_14 = arith.constant 0 : index
    %c0_15 = arith.constant 0 : index
    %19 = vector.load %arg4[%c0_14, %c0_15] : memref<256x4xf32, #tpu.memory_space<vmem>>, vector<256x4xf32>
    %cst_16 = arith.constant 0.000000e+00 : f32
    %20 = vector.broadcast %cst_16 : f32 to vector<256x4xf32>
    %21 = arith.maximumf %18, %20 : vector<256x4xf32>
    %22 = arith.mulf %18, %19 : vector<256x4xf32>
    %23 = arith.subf %21, %22 : vector<256x4xf32>
    %24 = math.absf %18 : vector<256x4xf32>
    %cst_17 = arith.constant 0.000000e+00 : f32
    %25 = vector.broadcast %cst_17 : f32 to vector<256x4xf32>
    %26 = arith.subf %25, %24 : vector<256x4xf32>
    %27 = math.exp %26 : vector<256x4xf32>
    %28 = math.log1p %27 : vector<256x4xf32>
    %29 = arith.addf %23, %28 : vector<256x4xf32>
    %c1_i32 = arith.constant 1 : i32
    %30 = arith.muli %arg0, %c1_i32 : i32
    %31 = arith.addi %30, %arg1 : i32
    %32 = tpu.iota {dimensions = array<i32: 0>} : vector<256x4xi32>
    %33 = tpu.iota {dimensions = array<i32: 1>} : vector<256x4xi32>
    %c256_i32 = arith.constant 256 : i32
    %34 = arith.muli %31, %c256_i32 : i32
    %35 = vector.broadcast %34 : i32 to vector<256x4xi32>
    %36 = arith.addi %35, %32 : vector<256x4xi32>
    %c4_i32 = arith.constant 4 : i32
    %37 = vector.broadcast %c4_i32 : i32 to vector<256x4xi32>
    %38 = arith.muli %36, %37 : vector<256x4xi32>
    %39 = arith.addi %38, %33 : vector<256x4xi32>
    %c8_i32 = arith.constant 8 : i32
    %40 = vector.broadcast %c8_i32 : i32 to vector<256x4xi32>
    %41 = arith.cmpi slt, %39, %40 : vector<256x4xi32>
    %cst_18 = arith.constant 0.000000e+00 : f32
    %42 = vector.broadcast %cst_18 : f32 to vector<256x4xf32>
    %43 = arith.select %41, %29, %42 : vector<256x4xi1>, vector<256x4xf32>
    %c0_19 = arith.constant 0 : index
    %c0_20 = arith.constant 0 : index
    %44 = vector.load %arg9[%c0_19, %c0_20] : memref<8x4xf32, #tpu.memory_space<vmem>>, vector<8x4xf32>
    %45 = vector.shape_cast %43 : vector<256x4xf32> to vector<32x8x4xf32>
    %cst_21 = arith.constant dense<0.000000e+00> : vector<8x4xf32>
    %46 = vector.multi_reduction <add>, %45, %cst_21 [0] : vector<32x8x4xf32> to vector<8x4xf32>
    %47 = arith.addf %44, %46 : vector<8x4xf32>
    %c0_22 = arith.constant 0 : index
    %c0_23 = arith.constant 0 : index
    %48 = vector.load %arg9[%c0_22, %c0_23] : memref<8x4xf32, #tpu.memory_space<vmem>>, vector<8x4xf32>
    tpu.vector_store %arg9[%c0_22, %c0_23], %47 {strides = array<i32>} : memref<8x4xf32, #tpu.memory_space<vmem>>, vector<8x4xf32>,
    return
  }
  func.func @transform_0(%arg0: i32, %arg1: i32) -> (i32, i32) {
    %c1_i32 = arith.constant 1 : i32
    %0 = arith.muli %arg0, %c1_i32 : i32
    %1 = arith.addi %0, %arg1 : i32
    %c0_i32 = arith.constant 0 : i32
    %c0_i32_0 = arith.constant 0 : i32
    return %1, %c0_i32 : i32, i32
  }
  func.func @transform_1(%arg0: i32, %arg1: i32) -> (i32, i32) {
    %c1_i32 = arith.constant 1 : i32
    %0 = arith.muli %arg0, %c1_i32 : i32
    %1 = arith.addi %0, %arg1 : i32
    %c0_i32 = arith.constant 0 : i32
    %c0_i32_0 = arith.constant 0 : i32
    return %1, %c0_i32 : i32, i32
  }
  func.func @transform_2(%arg0: i32, %arg1: i32) -> (i32, i32) {
    %c1_i32 = arith.constant 1 : i32
    %0 = arith.muli %arg0, %c1_i32 : i32
    %1 = arith.addi %0, %arg1 : i32
    %c0_i32 = arith.constant 0 : i32
    %c0_i32_0 = arith.constant 0 : i32
    return %1, %c0_i32 : i32, i32
  }
  func.func @transform_3(%arg0: i32, %arg1: i32) -> (i32, i32) {
    %c0_i32 = arith.constant 0 : i32
    %c0_i32_0 = arith.constant 0 : i32
    %c0_i32_1 = arith.constant 0 : i32
    return %c0_i32, %c0_i32_0 : i32, i32
  }
  func.func @transform_4(%arg0: i32, %arg1: i32) -> (i32, i32) {
    %c0_i32 = arith.constant 0 : i32
    %c0_i32_0 = arith.constant 0 : i32
    %c0_i32_1 = arith.constant 0 : i32
    return %c0_i32, %c0_i32_0 : i32, i32
  }
  func.func @transform_5(%arg0: i32, %arg1: i32) -> (i32, i32) {
    %c0_i32 = arith.constant 0 : i32
    %c0_i32_0 = arith.constant 0 : i32
    %c0_i32_1 = arith.constant 0 : i32
    return %c0_i32, %c0_i32_0 : i32, i32
  }
  func.func @transform_6(%arg0: i32, %arg1: i32) -> (i32, i32) {
    %c0_i32 = arith.constant 0 : i32
    %c0_i32_0 = arith.constant 0 : i32
    %c0_i32_1 = arith.constant 0 : i32
    return %c0_i32, %c0_i32_0 : i32, i32
  }
  func.func @transform_7(%arg0: i32, %arg1: i32) -> (i32, i32) {
    %c0_i32 = arith.constant 0 : i32
    %c0_i32_0 = arith.constant 0 : i32
    return %arg0, %c0_i32 : i32, i32
  }
}

</mosaic_0001>

<bundles_post_ra>
// kernel: tpu_custom_call.1
= control target key start
LH: loop header
LB: loop body
LE: loop exit
PB: predicated region body
PF: predicated region fallthrough
CT: control target
= control target key end

     0   :  { %s3174_s0 = inlined_call_operand.vmem [shape: f32[512,128], index: 0, kind: input, shape index: {}]   ;;  %s3175_s1 = inlined_call_operand.hbm [shape: f32[512,128], index: 1, kind: input, shape index: {}]   ;;  %s3176_s2 = inlined_call_operand.vmem [shape: f32[512,4], index: 2, kind: input, shape index: {}]   ;;  %s3177_s3 = inlined_call_operand.vmem [shape: f32[128,64], index: 3, kind: input, shape index: {}]   ;;  %s3178_s4 = inlined_call_operand.vmem [shape: f32[1,64], index: 4, kind: input, shape index: {}]   ;;  %s3179_s5 = inlined_call_operand.vmem [shape: f32[64,4], index: 5, kind: input, shape index: {}]   ;;  %s3180_s6 = inlined_call_operand.<no memory space> [shape: f32[1,1], index: 6, kind: input, shape index: {}]   ;;  %s3181_s7 = inlined_call_operand.vmem [shape: f32[16,4], index: 7, kind: output, shape index: {}]  }
   0x1   :  { %v12_v0 = vstv %s3180_s6 }
   0x2   :  { %13 = vst [vmem:[#allocation2] sm:$0x1] %v12_v0 }
   0x3   :  { %14 = vsyncpa [#allocation4], 0 }
   0x4   :  { %16 = vsyncpa [#allocation4 + $0x1], 0  ;;  %s2232_s26 = smov 0   ;;  %s2234_s27 = smov 0  }
   0x5   :  { %s2236_s28 = smov 0   ;;  %s2238_s29 = smov 0  }
   0x6   :  { %s2240_s30 = smov 0   ;;  %s2242_s8 = smov 0  }
   0x7 LB: > { %s1839_s6 = sadd.s32 4294967295, %s2183_s8   ;;  %s34_s9 = sadd.s32 1, %s2179_s30  ;;  %s2183_s8 = sphi %s2242_s8, %s22_s8   ;;  %s2179_s30 = sphi %s2240_s30, %s3208_s30   ;;  %s2175_s29 = sphi %s2238_s29, %s3207_s29   ;;  %s2171_s28 = sphi %s2236_s28, %s3206_s28   ;;  %s2167_s27 = sphi %s2234_s27, %s3205_s27   ;;  %s2163_s26 = sphi %s2232_s26, %s3204_s26  }
   0x8   : > { %p36_p0 = scmp.ge.s32.totalorder %s34_s9, 2  ;;  %s71_s10 = sadd.s32 1, %s2171_s28 }
   0x9   : > { %p78_p1 = scmp.ne.s32.totalorder %s2171_s28, %s2167_s27  ;;  %p79_p2 = scmp.eq.s32.totalorder %s2183_s8, 0 }
   0xa   : > { %s3210_s9 = smov (%p36_p0, %s34_s9), 0  ;;  %p84_p4 = scmp.ne.s32.totalorder %s2167_s27, %s2163_s26 }
   0xb   : > { %p2268_p3 = por %p79_p2, %p78_p1  ;;  %s68_s12 = ssub.s32 %s2179_s30, %s3210_s9 }
   0xc   : > { %p85_p5 = scmp.eq.s32.totalorder %s1839_s6, 0  ;;  %p69_p6 = scmp.eq.s32.totalorder %s68_s12, 0 }
   0xd   : > { %p1919_p8 = scmp.lt.s32.totalorder %s2183_s8, 2  ;;  %s269_s15 = sand.u32 1, %s2171_s28  }
   0xe   : > { %p2275_p7 = por %p85_p5, %p84_p4  ;;  %s1888_s16 = sshll.u32 %s2179_s30, 8 }
   0xf   : > { %s2281_s14 = scalar_select %p69_p6, %s2171_s28, %s71_s10  }
  0x10   : > { %s1843_s17 = sshll.u32 %s269_s15, 8  ;;  %s279_s20 = scalar_lea.hbm %s3175_s1, %s1888_s16 }
  0x11   : > { %s280_s21 = sshll.u32 %s279_s20, 4  ;;  %s273_s22 = scalar_lea.vmem [#allocation3], %s1843_s17  ;;  %s281_s21 = int_to_ptr.hbm [resolvable:$true] %s280_s21 }
  0x12   : > { %s282_s23 = sshll.u32 %s273_s22, 4  ;;  %p1916_p9 = pnand %p1919_p8, %p2268_p3  ;;  %s283_s23 = int_to_ptr.vmem [resolvable:$true] %s282_s23 }
  0x13   : > { %p1846_p10 = scmp.ge.s32.totalorder %s2183_s8, 1  ;;  %p301_p11 = scmp.lt.s32.totalorder %s2183_s8, 3 }
  0x14   : > { %s270_s24 = scalar_lea.sflag [#allocation4], %s269_s15  ;;  %s2185_s25 = smov 128  }
  0x15   : > { %s2186_s26 = smov 8   ;;  %p302_p12 = pnand %p1846_p10, %p301_p11 }
  0x16   : > { %1918 = dma.hbm_to_vmem [thread:$0]  (!%p1916_p9), %s281_s21, 4096, %s283_s23, %s270_s24, %s2185_s25, %s2185_s25, %s2186_s26  }
  0x17   : > { %305 = sbr.rel (%p302_p12) target bundleno = 550 (0x226), region = 48  ;;  %s307_s6 = sand.u32 (!%p302_p12), 1, %s2167_s27  }
  0x18   : > { %s1847_s10 = sshll.u32 (!%p302_p12), %s307_s6, 8  ;;  %s308_s12 = scalar_lea.sflag (!%p302_p12), [#allocation4], %s307_s6 }
  0x19   : > { %s2293_s16 = scalar_lea.vmem (!%p302_p12), [#allocation3], %s1847_s10 }
  0x1c   : > { %2158 = dma.done.wait (%p2275_p7), %s308_s12, 4096  }
  0x1d   : > { %2160 = vsyncadd (%p2275_p7), %s308_s12, 4294963200  ;;  %v525_v1 = vld [vmem:[%s3177_s3 + $0x78] sm:$0xff]  ;;  %v524_v2 = vld [vmem:[%s3177_s3 + $0x70] sm:$0xff]  ;;  %s1848_s21 = sshll.u32 %s2175_s29, 5  ;;  %vm690_vm0 = vcmask 523264   ;;  %vm380_vm2 = vcmask 31744  }
  0x1e   : > { %530 = vmatpush.msra.mxu0 %v525_v1  ;;  %1889 = vmatpush.msra.mxu2 %v525_v1  ;;  %v523_v3 = vld [vmem:[%s3177_s3 + $0x68] sm:$0xff]  ;;  %v522_v4 = vld [vmem:[%s3177_s3 + $0x60] sm:$0xff]  ;;  %v521_v5 = vld [vmem:[%s3177_s3 + $0x58] sm:$0xff]  ;;  %p356_p13 = scmp.lt.s32.totalorder %s1848_s21, 63  ;;  %p372_p0 = scmp.lt.s32.totalorder %s2175_s29, 1 }
  0x1f   : > { %v520_v6 = vld [vmem:[%s3177_s3 + $0x50] sm:$0xff]  ;;  %v519_v7 = vld [vmem:[%s3177_s3 + $0x48] sm:$0xff]  ;;  %v518_v8 = vld [vmem:[%s3177_s3 + $0x40] sm:$0xff] }
  0x20   : > { %531 = vmatpush.msra.mxu0 %v524_v2  ;;  %1890 = vmatpush.msra.mxu2 %v524_v2  ;;  %s3212_s21 = smov (!%p356_p13, %s1848_s21), 63  ;;  %v517_v9 = vld [vmem:[%s3177_s3 + $0x38] sm:$0xff]  ;;  %v516_v10 = vld [vmem:[%s3177_s3 + $0x30] sm:$0xff]  ;;  %v515_v11 = vld [vmem:[%s3177_s3 + $0x28] sm:$0xff] }
  0x21   : > { %s1849_s18 = sshll.u32 %s3212_s21, 3  ;;  %v514_v12 = vld [vmem:[%s3177_s3 + $0x20] sm:$0xff]  ;;  %v513_v17 = vld [vmem:[%s3177_s3 + $0x18] sm:$0xff]  ;;  %v512_v18 = vld [vmem:[%s3177_s3 + $0x10] sm:$0xff]  ;;  %s1885_s21 = sshll.u32 %s2175_s29, 8 }
  0x22   : > { %532 = vmatpush.msra.mxu0 %v523_v3  ;;  %1891 = vmatpush.msra.mxu2 %v523_v3  ;;  %s2338_s23 = scalar_lea.vmem %s3174_s0, %s1849_s18  ;;  %v414_v14 = vld [vmem:[%s2293_s16] sm:$0xff]  ;;  %v429_v16 = vld [vmem:[%s2293_s16 + $0x78] sm:$0xff]  ;;  %v415_v26 = vld [vmem:[%s2293_s16 + $0x8] sm:$0xff]  ;;  %s2519_s10 = scalar_lea.vmem %s3176_s2, %s1849_s18 }
  0x23   : > { %v382_v13 = vld [vmem:[%s2338_s23] sm:$0xff]  ;;  %v397_v15 = vld [vmem:[%s2338_s23 + $0x78] sm:$0xff]  ;;  %v511_v21 = vld [vmem:[%s3177_s3 + $0x8] sm:$0xff]  ;;  %s3214_s29 = smov (!%p372_p0, %s2175_s29), 1 }
  0x24   : > { %533 = vmatpush.msra.mxu0 %v522_v4  ;;  %1892 = vmatpush.msra.mxu2 %v522_v4  ;;  %v446_v19 = vsub.f32 %v382_v13, %v414_v14  ;;  %v461_v20 = vsub.f32 %v397_v15, %v429_v16  ;;  %v510_v22 = vld [vmem:[%s3177_s3] sm:$0xff]  ;;  %v383_v25 = vld [vmem:[%s2338_s23 + $0x8] sm:$0xff]  ;;  %v384_v33 = vld [vmem:[%s2338_s23 + $0x10] sm:$0xff]  ;;  %s1852_s18 = sshll.u32 %s3214_s29, 3 }
  0x25   : > { %v398_v27 = vld [vmem:[%s2338_s23 + $0x80] sm:$0xff]  ;;  %v447_v29 = vsub.f32 %v383_v25, %v415_v26  ;;  %v416_v34 = vld [vmem:[%s2293_s16 + $0x10] sm:$0xff]  ;;  %v399_v35 = vld [vmem:[%s2338_s23 + $0x88] sm:$0xff]  ;;  %s3037_s11 = scalar_lea.vmem %s3181_s7, %s1852_s18 }
  0x26   : > { %534 = vmatpush.msra.mxu0 %v521_v5  ;;  %1893 = vmatpush.msra.mxu2 %v521_v5  ;;  %v478_v23 = vand.u32 2147483647, %v446_v19  ;;  %v493_v24 = vand.u32 2147483647, %v461_v20  ;;  %v430_v28 = vld [vmem:[%s2293_s16 + $0x80] sm:$0xff]  ;;  %v431_v36 = vld [vmem:[%s2293_s16 + $0x88] sm:$0xff]  ;;  %v448_v37 = vsub.f32 %v384_v33, %v416_v34 }
  0x27   : > { %v462_v30 = vsub.f32 %v398_v27, %v430_v28  ;;  %v479_v31 = vand.u32 2147483647, %v447_v29  ;;  %v463_v38 = vsub.f32 %v399_v35, %v431_v36  ;;  %v385_v41 = vld [vmem:[%s2338_s23 + $0x18] sm:$0xff]  ;;  %v400_v43 = vld [vmem:[%s2338_s23 + $0x90] sm:$0xff]  ;;  %v386_v49 = vld [vmem:[%s2338_s23 + $0x20] sm:$0xff] }
  0x28   : > { %535 = vmatpush.msra.mxu0 %v520_v6  ;;  %1894 = vmatpush.msra.mxu2 %v520_v6  ;;  %v480_v39 = vand.u32 2147483647, %v448_v37  ;;  %v417_v42 = vld [vmem:[%s2293_s16 + $0x18] sm:$0xff]  ;;  %v432_v44 = vld [vmem:[%s2293_s16 + $0x90] sm:$0xff]  ;;  %v418_v50 = vld [vmem:[%s2293_s16 + $0x20] sm:$0xff] }
  0x29   : > { %v494_v32 = vand.u32 2147483647, %v462_v30  ;;  %v495_v40 = vand.u32 2147483647, %v463_v38  ;;  %v449_v45 = vsub.f32 %v385_v41, %v417_v42  ;;  %v464_v46 = vsub.f32 %v400_v43, %v432_v44  ;;  %v401_v51 = vld [vmem:[%s2338_s23 + $0x98] sm:$0xff]  ;;  %v387_v57 = vld [vmem:[%s2338_s23 + $0x28] sm:$0xff] }
  0x2a   : > { %536 = vmatpush.msra.mxu0 %v519_v7  ;;  %1895 = vmatpush.msra.mxu2 %v519_v7  ;;  %v433_v52 = vld [vmem:[%s2293_s16 + $0x98] sm:$0xff]  ;;  %v450_v53 = vsub.f32 %v386_v49, %v418_v50  ;;  %v419_v58 = vld [vmem:[%s2293_s16 + $0x28] sm:$0xff]  ;;  %v434_v60 = vld [vmem:[%s2293_s16 + $0xa0] sm:$0xff] }
  0x2b   : > { %v481_v47 = vand.u32 2147483647, %v449_v45  ;;  %v496_v48 = vand.u32 2147483647, %v464_v46  ;;  %v465_v54 = vsub.f32 %v401_v51, %v433_v52  ;;  %v402_v59 = vld [vmem:[%s2338_s23 + $0xa0] sm:$0xff]  ;;  %v451_v61 = vsub.f32 %v387_v57, %v419_v58  ;;  %v388_v1 = vld [vmem:[%s2338_s23 + $0x30] sm:$0xff] }
  0x2c   : > { %537 = vmatpush.msra.mxu0 %v518_v8  ;;  %1896 = vmatpush.msra.mxu2 %v518_v8  ;;  %v482_v55 = vand.u32 2147483647, %v450_v53  ;;  %v466_v62 = vsub.f32 %v402_v59, %v434_v60  ;;  %v420_v2 = vld [vmem:[%s2293_s16 + $0x30] sm:$0xff]  ;;  %v403_v3 = vld [vmem:[%s2338_s23 + $0xa8] sm:$0xff]  ;;  %v437_v20 = vld [vmem:[%s2293_s16 + $0xb8] sm:$0xff] }
  0x2d   : > { %v497_v56 = vand.u32 2147483647, %v465_v54  ;;  %v483_v63 = vand.u32 2147483647, %v451_v61  ;;  %v435_v4 = vld [vmem:[%s2293_s16 + $0xa8] sm:$0xff]  ;;  %v452_v5 = vsub.f32 %v388_v1, %v420_v2  ;;  %v405_v19 = vld [vmem:[%s2338_s23 + $0xb8] sm:$0xff] }
  0x2e   : > { %538 = vmatpush.msra.mxu0 %v517_v9  ;;  %1897 = vmatpush.msra.mxu2 %v517_v9  ;;  %v498_v0 = vand.u32 2147483647, %v466_v62  ;;  %v467_v6 = vsub.f32 %v403_v3, %v435_v4  ;;  %v389_v9 = vld [vmem:[%s2338_s23 + $0x38] sm:$0xff]  ;;  %v391_v25 = vld [vmem:[%s2338_s23 + $0x48] sm:$0xff]  ;;  %v406_v27 = vld [vmem:[%s2338_s23 + $0xc0] sm:$0xff] }
  0x2f   : > { %v484_v7 = vand.u32 2147483647, %v452_v5  ;;  %v423_v26 = vld [vmem:[%s2293_s16 + $0x48] sm:$0xff]  ;;  %v438_v28 = vld [vmem:[%s2293_s16 + $0xc0] sm:$0xff]  ;;  %v424_v34 = vld [vmem:[%s2293_s16 + $0x50] sm:$0xff] }
  0x30   : > { %539 = vmatpush.msra.mxu0 %v516_v10  ;;  %1898 = vmatpush.msra.mxu2 %v516_v10  ;;  %v499_v8 = vand.u32 2147483647, %v467_v6  ;;  %v421_v10 = vld [vmem:[%s2293_s16 + $0x38] sm:$0xff]  ;;  %v455_v29 = vsub.f32 %v391_v25, %v423_v26  ;;  %v470_v30 = vsub.f32 %v406_v27, %v438_v28  ;;  %v392_v33 = vld [vmem:[%s2338_s23 + $0x50] sm:$0xff]  ;;  %v407_v35 = vld [vmem:[%s2338_s23 + $0xc8] sm:$0xff] }
  0x31   : > { %v453_v13 = vsub.f32 %v389_v9, %v421_v10  ;;  %v439_v36 = vld [vmem:[%s2293_s16 + $0xc8] sm:$0xff]  ;;  %v456_v37 = vsub.f32 %v392_v33, %v424_v34  ;;  %v393_v41 = vld [vmem:[%s2338_s23 + $0x58] sm:$0xff]  ;;  %v394_v52 = vld [vmem:[%s2338_s23 + $0x60] sm:$0xff] }
  0x32   : > { %540 = vmatpush.msra.mxu0 %v515_v11  ;;  %1899 = vmatpush.msra.mxu2 %v515_v11  ;;  %v404_v11 = vld [vmem:[%s2338_s23 + $0xb0] sm:$0xff]  ;;  %v471_v38 = vsub.f32 %v407_v35, %v439_v36  ;;  %v425_v42 = vld [vmem:[%s2293_s16 + $0x58] sm:$0xff]  ;;  %v680_v49 = vld [vmem:[%s3179_s5 + $0x28] sm:$0xff] }
  0x33   : > { %v485_v15 = vand.u32 2147483647, %v453_v13  ;;  %v408_v43 = vld [vmem:[%s2338_s23 + $0xd0] sm:$0xff]  ;;  %v457_v45 = vsub.f32 %v393_v41, %v425_v42  ;;  %v426_v53 = vld [vmem:[%s2293_s16 + $0x60] sm:$0xff]  ;;  %v409_v54 = vld [vmem:[%s2338_s23 + $0xd8] sm:$0xff] }
  0x34   : > { %541 = vmatpush.msra.mxu0 %v514_v12  ;;  %1900 = vmatpush.msra.mxu2 %v514_v12  ;;  %v436_v12 = vld [vmem:[%s2293_s16 + $0xb0] sm:$0xff]  ;;  %v679_v58 = vld [vmem:[%s3179_s5 + $0x20] sm:$0xff]  ;;  %v395_v62 = vld [vmem:[%s2338_s23 + $0x68] sm:$0xff] }
  0x35   : > { %v468_v14 = vsub.f32 %v404_v11, %v436_v12  ;;  %v440_v44 = vld [vmem:[%s2293_s16 + $0xd0] sm:$0xff]  ;;  %v489_v50 = vand.u32 2147483647, %v457_v45  ;;  %v410_v1 = vld [vmem:[%s2338_s23 + $0xe0] sm:$0xff]  ;;  %v676_v3 = vld [vmem:[%s3179_s5 + $0x8] sm:$0xff] }
  0x36   : > { %542 = vmatpush.msra.mxu0 %v513_v17  ;;  %1901 = vmatpush.msra.mxu2 %v513_v17  ;;  %v390_v17 = vld [vmem:[%s2338_s23 + $0x40] sm:$0xff]  ;;  %v472_v46 = vsub.f32 %v408_v43, %v440_v44  ;;  %v678_v59 = vld [vmem:[%s3179_s5 + $0x18] sm:$0xff]  ;;  %v396_v9 = vld [vmem:[%s2338_s23 + $0x70] sm:$0xff] }
  0x37   : > { %v500_v16 = vand.u32 2147483647, %v468_v14  ;;  %v442_v2 = vld [vmem:[%s2293_s16 + $0xe0] sm:$0xff]  ;;  %v428_v10 = vld [vmem:[%s2293_s16 + $0x70] sm:$0xff]  ;;  %v443_v12 = vld [vmem:[%s2293_s16 + $0xe8] sm:$0xff] }
  0x38   : > { %543 = vmatpush.msra.mxu0 %v512_v18  ;;  %1902 = vmatpush.msra.mxu2 %v512_v18  ;;  %v422_v18 = vld [vmem:[%s2293_s16 + $0x40] sm:$0xff]  ;;  %v504_v51 = vand.u32 2147483647, %v472_v46  ;;  %v474_v5 = vsub.f32 %v410_v1, %v442_v2  ;;  %v460_v13 = vsub.f32 %v396_v9, %v428_v10  ;;  %v2449_v26 = vld [vmem:[%s3178_s4] ss:$0 sm:$0xff] }
  0x39   : > { %v675_v6 = vld [vmem:[%s3179_s5] sm:$0xff]  ;;  %v411_v11 = vld [vmem:[%s2338_s23 + $0xe8] sm:$0xff] }
  0x3a   : > { %544 = vmatpush.msra.mxu0 %v511_v21  ;;  %1903 = vmatpush.msra.mxu2 %v511_v21  ;;  %v454_v21 = vsub.f32 %v390_v17, %v422_v18  ;;  %v475_v14 = vsub.f32 %v411_v11, %v443_v12  ;;  %v2187_v18 = vmov 0  }
  0x3b   : > { %1972 = vset.pattern.permute.xlu0 %v2187_v18 }
  0x3c   : > { %545 = vmatpush.msra.mxu0 %v510_v22  ;;  %1904 = vmatpush.msra.mxu2 %v510_v22  ;;  %v469_v22 = vsub.f32 %v405_v19, %v437_v20  ;;  %v507_v17 = vand.u32 2147483647, %v475_v14  ;;  %v412_v19 = vld [vmem:[%s2338_s23 + $0xf0] sm:$0xff] }
  0x3d   : > { %546 = vmatmul.f32.vlgmr.msra.gmra.mxu0 %v478_v23  ;;  %591 = vmatmul.f32.vlgmr.msra.gmra.mxu2 %v493_v24  ;;  %v486_v23 = vand.u32 2147483647, %v454_v21  ;;  %v444_v20 = vld [vmem:[%s2293_s16 + $0xf0] sm:$0xff] }
  0x3e   : > { %v501_v24 = vand.u32 2147483647, %v469_v22  ;;  %v476_v21 = vsub.f32 %v412_v19, %v444_v20 }
  0x40   : > { %v508_v22 = vand.u32 2147483647, %v476_v21 }
  0x45   : > { %549 = vmatmul.f32.gmra.mxu0 %v479_v31  ;;  %594 = vmatmul.f32.gmra.mxu2 %v494_v32  ;;  %v487_v31 = vand.u32 2147483647, %v455_v29  ;;  %v502_v32 = vand.u32 2147483647, %v470_v30 }
  0x4d   : > { %552 = vmatmul.f32.gmra.mxu0 %v480_v39  ;;  %597 = vmatmul.f32.gmra.mxu2 %v495_v40  ;;  %v488_v39 = vand.u32 2147483647, %v456_v37  ;;  %v503_v40 = vand.u32 2147483647, %v471_v38 }
  0x55   : > { %555 = vmatmul.f32.gmra.mxu0 %v481_v47  ;;  %600 = vmatmul.f32.gmra.mxu2 %v496_v48  ;;  %v682_v47 = vld [vmem:[%s3179_s5 + $0x38] sm:$0xff]  ;;  %v681_v48 = vld [vmem:[%s3179_s5 + $0x30] sm:$0xff] }
  0x56   : > { %795 = vmatpush.msra.mxu1 %v682_v47  ;;  %1905 = vmatpush.msra.mxu3 %v682_v47 }
  0x58   : > { %796 = vmatpush.msra.mxu1 %v681_v48  ;;  %1906 = vmatpush.msra.mxu3 %v681_v48 }
  0x5a   : > { %797 = vmatpush.msra.mxu1 %v680_v49  ;;  %1907 = vmatpush.msra.mxu3 %v680_v49 }
  0x5c   : > { %798 = vmatpush.msra.mxu1 %v679_v58  ;;  %1908 = vmatpush.msra.mxu3 %v679_v58 }
  0x5d   : > { %558 = vmatmul.f32.gmra.mxu0 %v482_v55  ;;  %603 = vmatmul.f32.gmra.mxu2 %v497_v56  ;;  %v441_v55 = vld [vmem:[%s2293_s16 + $0xd8] sm:$0xff]  ;;  %v458_v56 = vsub.f32 %v394_v52, %v426_v53 }
  0x5e   : > { %v473_v57 = vsub.f32 %v409_v54, %v441_v55  ;;  %799 = vmatpush.msra.mxu1 %v678_v59  ;;  %1909 = vmatpush.msra.mxu3 %v678_v59 }
  0x5f   : > { %v490_v60 = vand.u32 2147483647, %v458_v56 }
  0x60   : > { %v505_v61 = vand.u32 2147483647, %v473_v57 }
  0x65   : > { %561 = vmatmul.f32.gmra.mxu0 %v483_v63  ;;  %606 = vmatmul.f32.gmra.mxu2 %v498_v0  ;;  %v677_v63 = vld [vmem:[%s3179_s5 + $0x10] sm:$0xff] }
  0x66   : > { %v427_v0 = vld [vmem:[%s2293_s16 + $0x68] sm:$0xff]  ;;  %800 = vmatpush.msra.mxu1 %v677_v63  ;;  %1910 = vmatpush.msra.mxu3 %v677_v63 }
  0x67   : > { %v459_v4 = vsub.f32 %v395_v62, %v427_v0 }
  0x68   : > { %801 = vmatpush.msra.mxu1 %v676_v3  ;;  %1911 = vmatpush.msra.mxu3 %v676_v3 }
  0x6a   : > { %802 = vmatpush.msra.mxu1 %v675_v6  ;;  %1912 = vmatpush.msra.mxu3 %v675_v6 }
  0x6d   : > { %564 = vmatmul.f32.gmra.mxu0 %v484_v7  ;;  %609 = vmatmul.f32.gmra.mxu2 %v499_v8  ;;  %v491_v7 = vand.u32 2147483647, %v459_v4  ;;  %v506_v8 = vand.u32 2147483647, %v474_v5 }
  0x75   : > { %567 = vmatmul.f32.gmra.mxu0 %v485_v15  ;;  %612 = vmatmul.f32.gmra.mxu2 %v500_v16  ;;  %v1974_v15 = vld [vmem:[#allocation2] ss:$0 sm:$0xff]  ;;  %v492_v16 = vand.u32 2147483647, %v460_v13 }
  0x76   : > { %687 = vperm.xlu0 %1972, %v1974_v15  }
  0x7d   : > { %570 = vmatmul.f32.gmra.mxu0 %v486_v23  ;;  %615 = vmatmul.f32.gmra.mxu2 %v501_v24  ;;  %v413_v23 = vld [vmem:[%s2338_s23 + $0xf8] sm:$0xff] }
  0x7e   : > { %v445_v24 = vld [vmem:[%s2293_s16 + $0xf8] sm:$0xff] }
  0x7f   : > { %v477_v25 = vsub.f32 %v413_v23, %v445_v24 }
  0x81   : > { %v509_v27 = vand.u32 2147483647, %v477_v25 }
  0x85   : > { %573 = vmatmul.f32.gmra.mxu0 %v487_v31  ;;  %618 = vmatmul.f32.gmra.mxu2 %v502_v32 }
  0x8d   : > { %576 = vmatmul.f32.gmra.mxu0 %v488_v39  ;;  %621 = vmatmul.f32.gmra.mxu2 %v503_v40 }
  0x95   : > { %579 = vmatmul.f32.gmra.mxu0 %v489_v50  ;;  %624 = vmatmul.f32.gmra.mxu2 %v504_v51 }
  0x9d   : > { %582 = vmatmul.f32.gmra.mxu0 %v490_v60  ;;  %627 = vmatmul.f32.gmra.mxu2 %v505_v61 }
  0xa5   : > { %585 = vmatmul.f32.gmra.mxu0 %v491_v7  ;;  %630 = vmatmul.f32.gmra.mxu2 %v506_v8 }
  0xad   : > { %588 = vmatmul.f32.gmra.mxu0 %v492_v16  ;;  %633 = vmatmul.f32.gmra.mxu2 %v507_v17 }
  0xb5   : > { %636 = vmatmul.f32.gmra.mxu2 %v508_v22 }
  0xba   : > { %v547_v28 = vpop.f32.mrf.mxu0 }
  0xbb   : > { %v548_v29 = vadd.f32 %v2449_v26, %v547_v28 }
  0xbd   : > { %v643_v30 = vmax.f32 %v548_v29, 0.0  ;;  %639 = vmatmul.f32.gmra.mxu2 %v509_v27 }
  0xbf   : > { %1853 = vmatmul.msk.f32.vlgmr.msra.gmra.mxu1 %vm690_vm0, %v643_v30 }
  0xc0   : > { %v2453_v31 = vpop.f32.mrf.mxu2 }
  0xc2   : > { %v550_v32 = vpop.f32.mrf.mxu0 }
  0xc3   : > { %v551_v33 = vadd.f32 %v2449_v26, %v550_v32 }
  0xc5   : > { %v644_v34 = vmax.f32 %v551_v33, 0.0 }
  0xc7   : > { %1854 = vmatmul.msk.f32.gmra.mxu1 %vm690_vm0, %v644_v34 }
  0xc8   : > { %v2457_v35 = vpop.f32.mrf.mxu2 }
  0xca   : > { %v553_v36 = vpop.f32.mrf.mxu0 }
  0xcb   : > { %v554_v37 = vadd.f32 %v2449_v26, %v553_v36 }
  0xcd   : > { %v645_v38 = vmax.f32 %v554_v37, 0.0 }
  0xcf   : > { %1855 = vmatmul.msk.f32.gmra.mxu1 %vm690_vm0, %v645_v38 }
  0xd0   : > { %v598_v39 = vpop.f32.mrf.mxu2 }
  0xd1   : > { %v599_v40 = vadd.f32 %v2449_v26, %v598_v39 }
  0xd2   : > { %v556_v41 = vpop.f32.mrf.mxu0 }
  0xd3   : > { %v660_v42 = vmax.f32 %v599_v40, 0.0  ;;  %v557_v43 = vadd.f32 %v2449_v26, %v556_v41 }
  0xd5   : > { %v646_v44 = vmax.f32 %v557_v43, 0.0  ;;  %1870 = vmatmul.msk.f32.vlgmr.msra.gmra.mxu3 %vm690_vm0, %v660_v42 }
  0xd7   : > { %1856 = vmatmul.msk.f32.gmra.mxu1 %vm690_vm0, %v646_v44 }
  0xd8   : > { %v601_v45 = vpop.f32.mrf.mxu2 }
  0xd9   : > { %v602_v46 = vadd.f32 %v2449_v26, %v601_v45 }
  0xda   : > { %v559_v47 = vpop.f32.mrf.mxu0 }
  0xdb   : > { %v661_v48 = vmax.f32 %v602_v46, 0.0  ;;  %v560_v49 = vadd.f32 %v2449_v26, %v559_v47 }
  0xdd   : > { %v647_v50 = vmax.f32 %v560_v49, 0.0  ;;  %1871 = vmatmul.msk.f32.gmra.mxu3 %vm690_vm0, %v661_v48 }
  0xdf   : > { %1857 = vmatmul.msk.f32.gmra.mxu1 %vm690_vm0, %v647_v50 }
  0xe0   : > { %v604_v51 = vpop.f32.mrf.mxu2 }
  0xe1   : > { %v605_v52 = vadd.f32 %v2449_v26, %v604_v51  ;;  %v593_v51 = vadd.f32 %v2449_v26, %v2453_v31 }
  0xe2   : > { %v562_v53 = vpop.f32.mrf.mxu0 }
  0xe3   : > { %v662_v54 = vmax.f32 %v605_v52, 0.0  ;;  %v563_v55 = vadd.f32 %v2449_v26, %v562_v53 }
  0xe5   : > { %v648_v56 = vmax.f32 %v563_v55, 0.0  ;;  %1872 = vmatmul.msk.f32.gmra.mxu3 %vm690_vm0, %v662_v54  ;;  %v658_v54 = vmax.f32 %v593_v51, 0.0 }
  0xe7   : > { %1858 = vmatmul.msk.f32.gmra.mxu1 %vm690_vm0, %v648_v56  ;;  %v596_v56 = vadd.f32 %v2449_v26, %v2457_v35 }
  0xe8   : > { %v607_v57 = vpop.f32.mrf.mxu2 }
  0xe9   : > { %v608_v58 = vadd.f32 %v2449_v26, %v607_v57  ;;  %v2524_v57 = vpop.permute.xlu0 %687 }
  0xea   : > { %v565_v59 = vpop.f32.mrf.mxu0 }
  0xeb   : > { %v663_v60 = vmax.f32 %v608_v58, 0.0  ;;  %v566_v61 = vadd.f32 %v2449_v26, %v565_v59 }
  0xed   : > { %v649_v62 = vmax.f32 %v566_v61, 0.0  ;;  %1873 = vmatmul.msk.f32.gmra.mxu3 %vm690_vm0, %v663_v60  ;;  %v900_v60 = vld [vmem:[%s2519_s10] sm:$0xff]  ;;  %v659_v61 = vmax.f32 %v596_v56, 0.0 }
  0xef   : > { %1859 = vmatmul.msk.f32.gmra.mxu1 %vm690_vm0, %v649_v62 }
  0xf0   : > { %v610_v63 = vpop.f32.mrf.mxu2 }
  0xf1   : > { %v611_v0 = vadd.f32 %v2449_v26, %v610_v63 }
  0xf2   : > { %v568_v1 = vpop.f32.mrf.mxu0 }
  0xf3   : > { %v664_v2 = vmax.f32 %v611_v0, 0.0  ;;  %v569_v3 = vadd.f32 %v2449_v26, %v568_v1 }
  0xf5   : > { %v650_v4 = vmax.f32 %v569_v3, 0.0  ;;  %1874 = vmatmul.msk.f32.gmra.mxu3 %vm690_vm0, %v664_v2 }
  0xf7   : > { %1860 = vmatmul.msk.f32.gmra.mxu1 %vm690_vm0, %v650_v4 }
  0xf8   : > { %v613_v5 = vpop.f32.mrf.mxu2 }
  0xf9   : > { %v614_v6 = vadd.f32 %v2449_v26, %v613_v5  ;;  %v1477_v5 = vlaneseq }
  0xfa   : > { %v571_v7 = vpop.f32.mrf.mxu0 }
  0xfb   : > { %v665_v8 = vmax.f32 %v614_v6, 0.0  ;;  %v572_v9 = vadd.f32 %v2449_v26, %v571_v7 }
  0xfd   : > { %v651_v10 = vmax.f32 %v572_v9, 0.0  ;;  %1875 = vmatmul.msk.f32.gmra.mxu3 %vm690_vm0, %v665_v8  ;;  %v901_v9 = vld [vmem:[%s2519_s10 + $0x8] sm:$0xff] }
  0xff   : > { %1861 = vmatmul.msk.f32.gmra.mxu1 %vm690_vm0, %v651_v10 }
 0x100   : > { %v616_v11 = vpop.f32.mrf.mxu2 }
 0x101   : > { %v617_v12 = vadd.f32 %v2449_v26, %v616_v11  ;;  %v2536_v11 = vshrl.u32 %v1477_v5, 7 }
 0x102   : > { %v574_v13 = vpop.f32.mrf.mxu0 }
 0x103   : > { %v666_v14 = vmax.f32 %v617_v12, 0.0  ;;  %v575_v15 = vadd.f32 %v2449_v26, %v574_v13 }
 0x105   : > { %v652_v16 = vmax.f32 %v575_v15, 0.0  ;;  %1876 = vmatmul.msk.f32.gmra.mxu3 %vm690_vm0, %v666_v14  ;;  %v1479_v15 = vadd.s32 8, %v2536_v11 }
 0x107   : > { %1862 = vmatmul.msk.f32.gmra.mxu1 %vm690_vm0, %v652_v16 }
 0x108   : > { %v619_v17 = vpop.f32.mrf.mxu2 }
 0x109   : > { %v620_v18 = vadd.f32 %v2449_v26, %v619_v17 }
 0x10a   : > { %v577_v19 = vpop.f32.mrf.mxu0 }
 0x10b   : > { %v667_v20 = vmax.f32 %v620_v18, 0.0  ;;  %v578_v21 = vadd.f32 %v2449_v26, %v577_v19 }
 0x10d   : > { %v653_v22 = vmax.f32 %v578_v21, 0.0  ;;  %1877 = vmatmul.msk.f32.gmra.mxu3 %vm690_vm0, %v667_v20 }
 0x10f   : > { %1863 = vmatmul.msk.f32.gmra.mxu1 %vm690_vm0, %v653_v22 }
 0x110   : > { %v622_v23 = vpop.f32.mrf.mxu2 }
 0x111   : > { %v623_v24 = vadd.f32 %v2449_v26, %v622_v23 }
 0x112   : > { %v580_v25 = vpop.f32.mrf.mxu0 }
 0x113   : > { %v668_v27 = vmax.f32 %v623_v24, 0.0  ;;  %v581_v28 = vadd.f32 %v2449_v26, %v580_v25  ;;  %v902_v24 = vld [vmem:[%s2519_s10 + $0x10] sm:$0xff] }
 0x115   : > { %v654_v29 = vmax.f32 %v581_v28, 0.0  ;;  %1878 = vmatmul.msk.f32.gmra.mxu3 %vm690_vm0, %v668_v27  ;;  %v1480_v28 = vadd.s32 16, %v2536_v11 }
 0x117   : > { %1864 = vmatmul.msk.f32.gmra.mxu1 %vm690_vm0, %v654_v29 }
 0x118   : > { %v625_v30 = vpop.f32.mrf.mxu2 }
 0x119   : > { %v626_v32 = vadd.f32 %v2449_v26, %v625_v30 }
 0x11a   : > { %v583_v33 = vpop.f32.mrf.mxu0 }
 0x11b   : > { %v669_v34 = vmax.f32 %v626_v32, 0.0  ;;  %v584_v36 = vadd.f32 %v2449_v26, %v583_v33  ;;  %v2550_v33 = vand.u32 127, %v1477_v5 }
 0x11d   : > { %v655_v37 = vmax.f32 %v584_v36, 0.0  ;;  %1879 = vmatmul.msk.f32.gmra.mxu3 %vm690_vm0, %v669_v34 }
 0x11f   : > { %1865 = vmatmul.msk.f32.gmra.mxu1 %vm690_vm0, %v655_v37 }
 0x120   : > { %v628_v38 = vpop.f32.mrf.mxu2 }
 0x121   : > { %v629_v39 = vadd.f32 %v2449_v26, %v628_v38 }
 0x122   : > { %v586_v40 = vpop.f32.mrf.mxu0 }
 0x123   : > { %v670_v41 = vmax.f32 %v629_v39, 0.0  ;;  %v587_v42 = vadd.f32 %v2449_v26, %v586_v40 }
 0x125   : > { %v656_v43 = vmax.f32 %v587_v42, 0.0  ;;  %1880 = vmatmul.msk.f32.gmra.mxu3 %vm690_vm0, %v670_v41 }
 0x127   : > { %1866 = vmatmul.msk.f32.gmra.mxu1 %vm690_vm0, %v656_v43 }
 0x128   : > { %v631_v44 = vpop.f32.mrf.mxu2 }
 0x129   : > { %v632_v45 = vadd.f32 %v2449_v26, %v631_v44 }
 0x12a   : > { %v589_v46 = vpop.f32.mrf.mxu0 }
 0x12b   : > { %v671_v47 = vmax.f32 %v632_v45, 0.0  ;;  %v590_v48 = vadd.f32 %v2449_v26, %v589_v46 }
 0x12d   : > { %v657_v49 = vmax.f32 %v590_v48, 0.0  ;;  %1881 = vmatmul.msk.f32.gmra.mxu3 %vm690_vm0, %v671_v47 }
 0x12f   : > { %1867 = vmatmul.msk.f32.gmra.mxu1 %vm690_vm0, %v657_v49 }
 0x130   : > { %v634_v50 = vpop.f32.mrf.mxu2 }
 0x131   : > { %v635_v52 = vadd.f32 %v2449_v26, %v634_v50  ;;  %v903_v50 = vld [vmem:[%s2519_s10 + $0x18] sm:$0xff] }
 0x133   : > { %v672_v53 = vmax.f32 %v635_v52, 0.0 }
 0x135   : > { %1882 = vmatmul.msk.f32.gmra.mxu3 %vm690_vm0, %v672_v53 }
 0x137   : > { %1868 = vmatmul.msk.f32.gmra.mxu1 %vm690_vm0, %v658_v54 }
 0x138   : > { %v637_v55 = vpop.f32.mrf.mxu2 }
 0x139   : > { %v638_v31 = vadd.f32 %v2449_v26, %v637_v55  ;;  %v1481_v55 = vadd.s32 24, %v2536_v11 }
 0x13b   : > { %v673_v58 = vmax.f32 %v638_v31, 0.0 }
 0x13c   : > { %v804_v59 = vpop.f32.mrf.mxu1 }
 0x13d   : > { %v805_v62 = vadd.f32 %v804_v59, %v2524_v57  ;;  %1883 = vmatmul.msk.f32.gmra.mxu3 %vm690_vm0, %v673_v58 }
 0x13f   : > { %v932_v63 = vmax.f32 %v805_v62, 0.0  ;;  %v964_v0 = vmul.f32 %v900_v60, %v805_v62  ;;  %v1028_v1 = vand.u32 2147483647, %v805_v62  ;;  %1869 = vmatmul.msk.f32.gmra.mxu1 %vm690_vm0, %v659_v61 }
 0x140   : > { %v640_v35 = vpop.f32.mrf.mxu2 }
 0x141   : > { %v2530_v2 = vsub.f32 %v932_v63, %v964_v0  ;;  %v1060_v3 = vsub.f32 0.0, %v1028_v1  ;;  %v641_v4 = vadd.f32 %v2449_v26, %v640_v35  ;;  %v2540_v26 = vstv %s1885_s21  ;;  %v917_v63 = vld [vmem:[%s2519_s10 + $0x88] sm:$0xff] }
 0x142   : > { %v1514_v21 = vadd.s32 %v2540_v26, %v2536_v11  ;;  %v1515_v22 = vadd.s32 %v2540_v26, %v1479_v15  ;;  %v1516_v41 = vadd.s32 %v2540_v26, %v1480_v28 }
 0x143   : > { %v1092_v6 = vmul.f32 1.442695, %v1060_v3  ;;  %v674_v7 = vmax.f32 %v641_v4, 0.0 }
 0x144   : > { %v807_v8 = vpop.f32.mrf.mxu1  ;;  %v1546_v34 = vmul.u32 4, %v1514_v21  ;;  %v1547_v36 = vmul.u32 4, %v1515_v22  ;;  %v1548_v54 = vmul.u32 4, %v1516_v41 }
 0x145   : > { %1975 = vpow2.f32 %v1092_v6  ;;  %v808_v10 = vadd.f32 %v807_v8, %v2524_v57  ;;  %1884 = vmatmul.msk.f32.gmra.mxu3 %vm690_vm0, %v674_v7 }
 0x146   : > { %v1578_v45 = vadd.s32 %v1546_v34, %v2550_v33  ;;  %v2557_v48 = vadd.s32 %v1547_v36, %v2550_v33  ;;  %v2569_v4 = vadd.s32 %v1548_v54, %v2550_v33  ;;  %v918_v36 = vld [vmem:[%s2519_s10 + $0x90] sm:$0xff] }
 0x147   : > { %v933_v12 = vmax.f32 %v808_v10, 0.0  ;;  %v965_v13 = vmul.f32 %v901_v9, %v808_v10  ;;  %v1029_v14 = vand.u32 2147483647, %v808_v10 }
 0x148   : > { %vm1610_vm3 = vcmp.lt.s32.totalorder %v1578_v45, 8  ;;  %vm1611_vm4 = vcmp.lt.s32.totalorder %v2557_v48, 8  ;;  %vm1612_vm7 = vcmp.lt.s32.totalorder %v2569_v4, 8 }
 0x149   : > { %v2542_v16 = vsub.f32 %v933_v12, %v965_v13  ;;  %v1061_v17 = vsub.f32 0.0, %v1029_v14 }
 0x14b   : > { %v1976_v18 = vpop.eup %1975  ;;  %v1094_v19 = vmul.f32 1.442695, %v1061_v17  ;;  %v904_v17 = vld [vmem:[%s2519_s10 + $0x20] sm:$0xff] }
 0x14c   : > { %v1156_v20 = vadd.f32 1.0, %v1976_v18  ;;  %v810_v23 = vpop.f32.mrf.mxu1  ;;  %v1159_v25 = vmul.f32 -0.5, %v1976_v18  ;;  %v1162_v40 = vand.u32 2147483647, %v1976_v18 }
 0x14d   : > { %1977 = vpow2.f32 %v1094_v19  ;;  %v811_v27 = vadd.f32 %v810_v23, %v2524_v57 }
 0x14e   : > { %1979 = vlog2.f32 %v1156_v20  ;;  %v1160_v37 = vadd.f32 1.0, %v1159_v25  ;;  %vm1163_vm1 = vcmp.lt.f32.partialorder %v1162_v40, 0.0004427343  ;;  %v1482_v40 = vadd.s32 32, %v2536_v11 }
 0x14f   : > { %v934_v29 = vmax.f32 %v811_v27, 0.0  ;;  %v966_v30 = vmul.f32 %v902_v24, %v811_v27  ;;  %v1030_v32 = vand.u32 2147483647, %v811_v27 }
 0x150   : > { %v1161_v52 = vmul.f32 %v1976_v18, %v1160_v37 }
 0x151   : > { %v2552_v38 = vsub.f32 %v934_v29, %v966_v30  ;;  %v1062_v39 = vsub.f32 0.0, %v1030_v32 }
 0x153   : > { %v1978_v42 = vpop.eup %1977  ;;  %v1096_v43 = vmul.f32 1.442695, %v1062_v39 }
 0x154   : > { %v1980_v44 = vpop.eup %1979  ;;  %v1165_v46 = vadd.f32 1.0, %v1978_v42  ;;  %v1168_v47 = vmul.f32 -0.5, %v1978_v42  ;;  %v813_v49 = vpop.f32.mrf.mxu1  ;;  %v1171_v3 = vand.u32 2147483647, %v1978_v42 }
 0x155   : > { %v1158_v51 = vmul.f32 0.6931472, %v1980_v44  ;;  %1981 = vpow2.f32 %v1096_v43  ;;  %v814_v53 = vadd.f32 %v813_v49, %v2524_v57 }
 0x156   : > { %1983 = vlog2.f32 %v1165_v46  ;;  %v1169_v61 = vadd.f32 1.0, %v1168_v47  ;;  %vm1172_vm5 = vcmp.lt.f32.partialorder %v1171_v3, 0.0004427343 }
 0x157   : > { %v1164_v56 = vsel %vm1163_vm1, %v1161_v52, %v1158_v51  ;;  %v935_v31 = vmax.f32 %v814_v53, 0.0  ;;  %v967_v58 = vmul.f32 %v903_v50, %v814_v53  ;;  %v1031_v59 = vand.u32 2147483647, %v814_v53 }
 0x158   : > { %v1444_v60 = vadd.f32 %v1164_v56, %v2530_v2  ;;  %v855_v62 = vpop.f32.mrf.mxu3  ;;  %v1517_v2 = vadd.s32 %v2540_v26, %v1481_v55  ;;  %v1170_v10 = vmul.f32 %v1978_v42, %v1169_v61 }
 0x159   : > { %v2564_v0 = vsub.f32 %v935_v31, %v967_v58  ;;  %v1063_v1 = vsub.f32 0.0, %v1031_v59  ;;  %v856_v35 = vadd.f32 %v855_v62, %v2524_v57  ;;  %v1518_v59 = vadd.s32 %v2540_v26, %v1482_v40  ;;  %v905_v62 = vld [vmem:[%s2519_s10 + $0x28] sm:$0xff] }
 0x15a   : > { %v1642_v21 = vsel %vm1610_vm3, %v1444_v60, 0.0  ;;  %v1549_v30 = vmul.u32 4, %v1517_v2 }
 0x15b   : > { %v1982_v5 = vpop.eup %1981  ;;  %v1098_v6 = vmul.f32 1.442695, %v1063_v1  ;;  %v949_v7 = vmax.f32 %v856_v35, 0.0  ;;  %v981_v8 = vmul.f32 %v917_v63, %v856_v35  ;;  %v1045_v14 = vand.u32 2147483647, %v856_v35 }
 0x15c   : > { %v1984_v9 = vpop.eup %1983  ;;  %v1174_v12 = vadd.f32 1.0, %v1982_v5  ;;  %v1177_v13 = vmul.f32 -0.5, %v1982_v5  ;;  %v816_v15 = vpop.f32.mrf.mxu1  ;;  %v1676_v42 = vsel %vm380_vm2, %v1642_v21, 0.0  ;;  %v1180_v44 = vand.u32 2147483647, %v1982_v5 }
 0x15d   : > { %v1167_v18 = vmul.f32 0.6931472, %v1984_v9  ;;  %1985 = vpow2.f32 %v1098_v6  ;;  %v2573_v19 = vsub.f32 %v949_v7, %v981_v8  ;;  %v817_v20 = vadd.f32 %v816_v15, %v2524_v57 }
 0x15e   : > { %1987 = vlog2.f32 %v1174_v12  ;;  %v1077_v22 = vsub.f32 0.0, %v1045_v14  ;;  %v1178_v29 = vadd.f32 1.0, %v1177_v13  ;;  %vm1181_vm6 = vcmp.lt.f32.partialorder %v1180_v44, 0.0004427343 }
 0x15f   : > { %v1173_v23 = vsel %vm1172_vm5, %v1170_v10, %v1167_v18  ;;  %v936_v24 = vmax.f32 %v817_v20, 0.0  ;;  %v968_v25 = vmul.f32 %v904_v17, %v817_v20  ;;  %v1032_v27 = vand.u32 2147483647, %v817_v20 }
 0x160   : > { %v1445_v28 = vadd.f32 %v1173_v23, %v2542_v16  ;;  %v1126_v32 = vmul.f32 1.442695, %v1077_v22  ;;  %v858_v34 = vpop.f32.mrf.mxu3  ;;  %v1179_v52 = vmul.f32 %v1982_v5, %v1178_v29  ;;  %v1581_v35 = vadd.s32 %v1549_v30, %v2550_v33 }
 0x161   : > { %v2579_v37 = vsub.f32 %v936_v24, %v968_v25  ;;  %v1064_v39 = vsub.f32 0.0, %v1032_v27  ;;  %v859_v41 = vadd.f32 %v858_v34, %v2524_v57  ;;  %v1550_v14 = vmul.u32 4, %v1518_v59  ;;  %v919_v27 = vld [vmem:[%s2519_s10 + $0x98] sm:$0xff] }
 0x162   : > { %v1643_v43 = vsel %vm1611_vm4, %v1445_v28, 0.0  ;;  %1989 = vpow2.f32 %v1126_v32  ;;  %vm1613_vm9 = vcmp.lt.s32.totalorder %v1581_v35, 8 }
 0x163   : > { %v1986_v16 = vpop.eup %1985  ;;  %v1677_v45 = vsel %vm380_vm2, %v1643_v43, 0.0  ;;  %v1100_v46 = vmul.f32 1.442695, %v1064_v39  ;;  %v950_v47 = vmax.f32 %v859_v41, 0.0  ;;  %v982_v49 = vmul.f32 %v918_v36, %v859_v41 }
 0x164   : > { %v1988_v50 = vpop.eup %1987  ;;  %v1678_v51 = vadd.f32 %v1677_v45, %v1676_v42  ;;  %v1183_v53 = vadd.f32 1.0, %v1986_v16  ;;  %v1186_v54 = vmul.f32 -0.5, %v1986_v16  ;;  %v819_v55 = vpop.f32.mrf.mxu1  ;;  %v1046_v48 = vand.u32 2147483647, %v859_v41 }
 0x165   : > { %v1176_v56 = vmul.f32 0.6931472, %v1988_v50  ;;  %1991 = vpow2.f32 %v1100_v46  ;;  %v2587_v31 = vsub.f32 %v950_v47, %v982_v49  ;;  %v820_v61 = vadd.f32 %v819_v55, %v2524_v57 }
 0x166   : > { %1993 = vlog2.f32 %v1183_v53  ;;  %v1078_v60 = vsub.f32 0.0, %v1046_v48  ;;  %v1187_v3 = vadd.f32 1.0, %v1186_v54  ;;  %v1189_v8 = vand.u32 2147483647, %v1986_v16 }
 0x167   : > { %v1182_v58 = vsel %vm1181_vm6, %v1179_v52, %v1176_v56  ;;  %v937_v4 = vmax.f32 %v820_v61, 0.0  ;;  %v969_v9 = vmul.f32 %v905_v62, %v820_v61  ;;  %v1033_v25 = vand.u32 2147483647, %v820_v61 }
 0x168   : > { %v1990_v63 = vpop.eup %1989  ;;  %v1446_v1 = vadd.f32 %v1182_v58, %v2552_v38  ;;  %v1128_v2 = vmul.f32 1.442695, %v1078_v60  ;;  %v861_v21 = vpop.f32.mrf.mxu3  ;;  %v1188_v23 = vmul.f32 %v1986_v16, %v1187_v3  ;;  %vm1190_vm8 = vcmp.lt.f32.partialorder %v1189_v8, 0.0004427343 }
 0x169   : > { %v1309_v5 = vadd.f32 1.0, %v1990_v63  ;;  %v1312_v6 = vmul.f32 -0.5, %v1990_v63  ;;  %v1315_v13 = vand.u32 2147483647, %v1990_v63  ;;  %v2596_v24 = vsub.f32 %v937_v4, %v969_v9 }
 0x16a   : > { %v1644_v7 = vsel %vm1612_vm7, %v1446_v1, 0.0  ;;  %v1582_v30 = vadd.s32 %v1550_v14, %v2550_v33  ;;  %v862_v32 = vadd.f32 %v861_v21, %v2524_v57  ;;  %v1065_v40 = vsub.f32 0.0, %v1033_v25 }
 0x16b   : > { %v1992_v10 = vpop.eup %1991  ;;  %v1679_v12 = vsel %vm380_vm2, %v1644_v7, 0.0  ;;  %1995 = vlog2.f32 %v1309_v5  ;;  %v1313_v38 = vadd.f32 1.0, %v1312_v6  ;;  %vm2602_vm10 = vcmp.lt.f32.partialorder %v1315_v13, 0.0004427343  ;;  %v920_v13 = vld [vmem:[%s2519_s10 + $0xa0] sm:$0xff] }
 0x16c   : > { %v1994_v15 = vpop.eup %1993  ;;  %v1680_v17 = vadd.f32 %v1679_v12, %v1678_v51  ;;  %v1192_v18 = vadd.f32 1.0, %v1992_v10  ;;  %v1195_v20 = vmul.f32 -0.5, %v1992_v10  ;;  %1997 = vpow2.f32 %v1128_v2  ;;  %v822_v50 = vpop.f32.mrf.mxu1 }
 0x16d   : > { %v1185_v22 = vmul.f32 0.6931472, %v1994_v15  ;;  %v1314_v36 = vmul.f32 %v1990_v63, %v1313_v38  ;;  %v1198_v42 = vand.u32 2147483647, %v1992_v10  ;;  %v951_v43 = vmax.f32 %v862_v32, 0.0 }
 0x16e   : > { %1999 = vlog2.f32 %v1192_v18  ;;  %v1196_v29 = vadd.f32 1.0, %v1195_v20  ;;  %v983_v44 = vmul.f32 %v919_v27, %v862_v32  ;;  %v1047_v16 = vand.u32 2147483647, %v862_v32 }
 0x16f   : > { %v1191_v28 = vsel %vm1190_vm8, %v1188_v23, %v1185_v22  ;;  %v1102_v47 = vmul.f32 1.442695, %v1065_v40  ;;  %v1483_v49 = vadd.s32 40, %v2536_v11  ;;  %v2617_v62 = vadd.f32 %v822_v50, %v2524_v57 }
 0x170   : > { %v1447_v34 = vadd.f32 %v1191_v28, %v2564_v0  ;;  %v1197_v52 = vmul.f32 %v1992_v10, %v1196_v29  ;;  %v2609_v53 = vsub.f32 %v951_v43, %v983_v44  ;;  %v1079_v54 = vsub.f32 0.0, %v1047_v16 }
 0x171   : > { %v1996_v41 = vpop.eup %1995  ;;  %2001 = vpow2.f32 %v1102_v47  ;;  %vm1199_vm11 = vcmp.lt.f32.partialorder %v1198_v42, 0.0004427343  ;;  %vm1614_vm12 = vcmp.lt.s32.totalorder %v1582_v30, 8  ;;  %v1519_v6 = vadd.s32 %v2540_v26, %v1483_v49 }
 0x172   : > { %v1645_v45 = vsel %vm1613_vm9, %v1447_v34, 0.0  ;;  %v1311_v46 = vmul.f32 0.6931472, %v1996_v41  ;;  %v1998_v51 = vpop.eup %1997  ;;  %v1130_v63 = vmul.f32 1.442695, %v1079_v54  ;;  %v1484_v30 = vadd.s32 48, %v2536_v11 }
 0x173   : > { %v1681_v0 = vsel %vm380_vm2, %v1645_v45, 0.0  ;;  %v1318_v58 = vadd.f32 1.0, %v1998_v51  ;;  %v1321_v59 = vmul.f32 -0.5, %v1998_v51  ;;  %v1324_v5 = vand.u32 2147483647, %v1998_v51 }
 0x174   : > { %v2000_v55 = vpop.eup %1999  ;;  %v1682_v56 = vadd.f32 %v1681_v0, %v1680_v17  ;;  %v1317_v48 = vsel %vm2602_vm10, %v1314_v36, %v1311_v46  ;;  %v1034_v2 = vand.u32 2147483647, %v2617_v62  ;;  %v1551_v17 = vmul.u32 4, %v1519_v6  ;;  %v825_v22 = vpop.f32.mrf.mxu1 }
 0x175   : > { %v2614_v60 = vadd.f32 %v1317_v48, %v2573_v19  ;;  %v1194_v61 = vmul.f32 0.6931472, %v2000_v55  ;;  %2003 = vlog2.f32 %v1318_v58  ;;  %v1322_v35 = vadd.f32 1.0, %v1321_v59  ;;  %v864_v19 = vpop.f32.mrf.mxu3 }
 0x176   : > { %2005 = vpow2.f32 %v1130_v63  ;;  %v1066_v10 = vsub.f32 0.0, %v1034_v2  ;;  %v865_v12 = vadd.f32 %v864_v19, %v2524_v57  ;;  %vm1325_vm13 = vcmp.lt.f32.partialorder %v1324_v5, 0.0004427343  ;;  %v906_v63 = vld [vmem:[%s2519_s10 + $0x30] sm:$0xff] }
 0x177   : > { %v1200_v1 = vsel %vm1199_vm11, %v1197_v52, %v1194_v61  ;;  %v2002_v8 = vpop.eup %2001  ;;  %v1323_v9 = vmul.f32 %v1998_v51, %v1322_v35  ;;  %v2630_v34 = vadd.f32 %v825_v22, %v2524_v57  ;;  %v1583_v39 = vadd.s32 %v1551_v17, %v2550_v33 }
 0x178   : > { %v1448_v3 = vadd.f32 %v1200_v1, %v2579_v37  ;;  %v1201_v37 = vadd.f32 1.0, %v2002_v8  ;;  %v1204_v18 = vmul.f32 -0.5, %v2002_v8  ;;  %v1104_v20 = vmul.f32 1.442695, %v1066_v10 }
 0x179   : > { %v952_v21 = vmax.f32 %v865_v12, 0.0  ;;  %v984_v25 = vmul.f32 %v920_v13, %v865_v12  ;;  %v1207_v41 = vand.u32 2147483647, %v2002_v8  ;;  %v1048_v43 = vand.u32 2147483647, %v865_v12 }
 0x17a   : > { %v1646_v7 = vsel %vm1614_vm12, %v1448_v3, 0.0  ;;  %2007 = vlog2.f32 %v1201_v37  ;;  %v1205_v36 = vadd.f32 1.0, %v1204_v18  ;;  %v1520_v16 = vadd.s32 %v2540_v26, %v1484_v30 }
 0x17b   : > { %v1683_v4 = vsel %vm380_vm2, %v1646_v7, 0.0  ;;  %v2004_v14 = vpop.eup %2003  ;;  %2009 = vpow2.f32 %v1104_v20  ;;  %v2633_v40 = vsub.f32 %v952_v21, %v984_v25  ;;  %v1080_v46 = vsub.f32 0.0, %v1048_v43 }
 0x17c   : > { %v1684_v15 = vadd.f32 %v1683_v4, %v1682_v56  ;;  %v1320_v38 = vmul.f32 0.6931472, %v2004_v14  ;;  %v2006_v23 = vpop.eup %2005  ;;  %v1206_v49 = vmul.f32 %v2002_v8, %v1205_v36  ;;  %vm1615_vm14 = vcmp.lt.s32.totalorder %v1583_v39, 8  ;;  %v828_v12 = vpop.f32.mrf.mxu1 }
 0x17d   : > { %v1327_v28 = vadd.f32 1.0, %v2006_v23  ;;  %v1330_v29 = vmul.f32 -0.5, %v2006_v23  ;;  %v1333_v44 = vand.u32 2147483647, %v2006_v23  ;;  %vm1208_vm15 = vcmp.lt.f32.partialorder %v1207_v41, 0.0004427343 }
 0x17e   : > { %v1326_v27 = vsel %vm1325_vm13, %v1323_v9, %v1320_v38  ;;  %v1132_v0 = vmul.f32 1.442695, %v1080_v46  ;;  %v1552_v48 = vmul.u32 4, %v1520_v16  ;;  %v938_v19 = vmax.f32 %v2617_v62, 0.0 }
 0x17f   : > { %v2627_v32 = vadd.f32 %v1326_v27, %v2587_v31  ;;  %2011 = vlog2.f32 %v1327_v28  ;;  %v1331_v42 = vadd.f32 1.0, %v1330_v29  ;;  %v1035_v31 = vand.u32 2147483647, %v2630_v34  ;;  %v907_v29 = vld [vmem:[%s2519_s10 + $0x38] sm:$0xff] }
 0x180   : > { %v2008_v45 = vpop.eup %2007  ;;  %vm1334_vm0 = vcmp.lt.f32.partialorder %v1333_v44, 0.0004427343  ;;  %2013 = vpow2.f32 %v1132_v0  ;;  %v1584_v8 = vadd.s32 %v1552_v48, %v2550_v33  ;;  %v1485_v9 = vadd.s32 56, %v2536_v11  ;;  %v867_v48 = vpop.f32.mrf.mxu3 }
 0x181   : > { %v1203_v47 = vmul.f32 0.6931472, %v2008_v45  ;;  %v2010_v50 = vpop.eup %2009  ;;  %v1332_v51 = vmul.f32 %v2006_v23, %v1331_v42  ;;  %v1067_v52 = vsub.f32 0.0, %v1035_v31  ;;  %v939_v46 = vmax.f32 %v2630_v34, 0.0 }
 0x182   : > { %v1210_v56 = vadd.f32 1.0, %v2010_v50  ;;  %v1213_v61 = vmul.f32 -0.5, %v2010_v50  ;;  %v1216_v4 = vand.u32 2147483647, %v2010_v50  ;;  %vm1616_vm1 = vcmp.lt.s32.totalorder %v1584_v8, 8 }
 0x183   : > { %v1209_v55 = vsel %vm1208_vm15, %v1206_v49, %v1203_v47  ;;  %v1106_v1 = vmul.f32 1.442695, %v1067_v52  ;;  %v971_v31 = vmul.f32 %v907_v29, %v2630_v34 }
 0x184   : > { %v1449_v58 = vadd.f32 %v1209_v55, %v2596_v24  ;;  %2015 = vlog2.f32 %v1210_v56  ;;  %v970_v24 = vmul.f32 %v906_v63, %v2617_v62  ;;  %v1214_v7 = vadd.f32 1.0, %v1213_v61  ;;  %v831_v49 = vpop.f32.mrf.mxu1 }
 0x185   : > { %v2012_v54 = vpop.eup %2011  ;;  %2017 = vpow2.f32 %v1106_v1  ;;  %vm1217_vm3 = vcmp.lt.f32.partialorder %v1216_v4, 0.0004427343  ;;  %v1521_v62 = vadd.s32 %v2540_v26, %v1485_v9  ;;  %v1486_v61 = vadd.s32 64, %v2536_v11  ;;  %v908_v9 = vld [vmem:[%s2519_s10 + $0x40] sm:$0xff] }
 0x186   : > { %v1329_v59 = vmul.f32 0.6931472, %v2012_v54  ;;  %v1647_v35 = vsel %vm1615_vm14, %v1449_v58, 0.0  ;;  %v2014_v10 = vpop.eup %2013  ;;  %v1002_v17 = vsub.f32 %v938_v19, %v970_v24  ;;  %v1215_v38 = vmul.f32 %v2010_v50, %v1214_v7 }
 0x187   : > { %v1685_v5 = vsel %vm380_vm2, %v1647_v35, 0.0  ;;  %v1336_v14 = vadd.f32 1.0, %v2014_v10  ;;  %v1339_v37 = vmul.f32 -0.5, %v2014_v10  ;;  %v1342_v27 = vand.u32 2147483647, %v2014_v10 }
 0x188   : > { %v1335_v3 = vsel %vm1334_vm0, %v1332_v51, %v1329_v59  ;;  %v1686_v2 = vadd.f32 %v1685_v5, %v1684_v15  ;;  %v2650_v15 = vadd.f32 %v828_v12, %v2524_v57  ;;  %v1553_v30 = vmul.u32 4, %v1521_v62  ;;  %v870_v12 = vpop.f32.mrf.mxu3 }
 0x189   : > { %v2642_v6 = vadd.f32 %v1335_v3, %v2609_v53  ;;  %2019 = vlog2.f32 %v1336_v14  ;;  %v1340_v21 = vadd.f32 1.0, %v1339_v37  ;;  %vm1343_vm4 = vcmp.lt.f32.partialorder %v1342_v27, 0.0004427343 }
 0x18a   : > { %v2016_v13 = vpop.eup %2015  ;;  %v1036_v36 = vand.u32 2147483647, %v2650_v15  ;;  %v1585_v50 = vadd.s32 %v1553_v30, %v2550_v33  ;;  %v2662_v58 = vadd.f32 %v831_v49, %v2524_v57  ;;  %v1003_v59 = vsub.f32 %v939_v46, %v971_v31 }
 0x18b   : > { %v1212_v53 = vmul.f32 0.6931472, %v2016_v13  ;;  %v2018_v18 = vpop.eup %2017  ;;  %v1341_v41 = vmul.f32 %v2014_v10, %v1340_v21  ;;  %v1522_v5 = vadd.s32 %v2540_v26, %v1486_v61  ;;  %v1487_v14 = vadd.s32 72, %v2536_v11 }
 0x18c   : > { %v1219_v22 = vadd.f32 1.0, %v2018_v18  ;;  %v1222_v23 = vmul.f32 -0.5, %v2018_v18  ;;  %v1068_v16 = vsub.f32 0.0, %v1036_v36  ;;  %v1225_v47 = vand.u32 2147483647, %v2018_v18  ;;  %v834_v4 = vpop.f32.mrf.mxu1 }
 0x18d   : > { %v1218_v20 = vsel %vm1217_vm3, %v1215_v38, %v1212_v53  ;;  %vm1617_vm6 = vcmp.lt.s32.totalorder %v1585_v50, 8  ;;  %v1037_v1 = vand.u32 2147483647, %v2662_v58  ;;  %v1554_v10 = vmul.u32 4, %v1522_v5 }
 0x18e   : > { %v1450_v25 = vadd.f32 %v1218_v20, %v1002_v17  ;;  %2021 = vlog2.f32 %v1219_v22  ;;  %v1223_v42 = vadd.f32 1.0, %v1222_v23  ;;  %v1108_v51 = vmul.f32 1.442695, %v1068_v16 }
 0x18f   : > { %v2020_v43 = vpop.eup %2019  ;;  %vm1226_vm5 = vcmp.lt.f32.partialorder %v1225_v47, 0.0004427343  ;;  %v1069_v19 = vsub.f32 0.0, %v1037_v1  ;;  %v2671_v37 = vadd.f32 %v834_v4, %v2524_v57  ;;  %v940_v17 = vmax.f32 %v2650_v15, 0.0 }
 0x190   : > { %v1648_v28 = vsel %vm1616_vm1, %v1450_v25, 0.0  ;;  %v1338_v45 = vmul.f32 0.6931472, %v2020_v43  ;;  %v1224_v54 = vmul.f32 %v2018_v18, %v1223_v42  ;;  %2023 = vpow2.f32 %v1108_v51  ;;  %v909_v42 = vld [vmem:[%s2519_s10 + $0x48] sm:$0xff] }
 0x191   : > { %v1687_v39 = vsel %vm380_vm2, %v1648_v28, 0.0  ;;  %v1110_v8 = vmul.f32 1.442695, %v1069_v19  ;;  %v972_v53 = vmul.f32 %v908_v9, %v2650_v15  ;;  %v1586_v18 = vadd.s32 %v1554_v10, %v2550_v33 }
 0x192   : > { %v1688_v44 = vadd.f32 %v1687_v39, %v1686_v2  ;;  %v1344_v52 = vsel %vm1343_vm4, %v1341_v41, %v1338_v45  ;;  %v1495_v20 = vadd.s32 136, %v2536_v11  ;;  %v1523_v25 = vadd.s32 %v2540_v26, %v1487_v14 }
 0x193   : > { %v2659_v55 = vadd.f32 %v1344_v52, %v2633_v40  ;;  %v1038_v27 = vand.u32 2147483647, %v2671_v37  ;;  %v2680_v28 = vadd.f32 %v867_v48, %v2524_v57  ;;  %v1004_v29 = vsub.f32 %v940_v17, %v972_v53 }
 0x194   : > { %v2022_v0 = vpop.eup %2021  ;;  %vm1618_vm8 = vcmp.lt.s32.totalorder %v1586_v18, 8  ;;  %v1555_v43 = vmul.u32 4, %v1523_v25  ;;  %v1531_v45 = vadd.s32 %v2540_v26, %v1495_v20  ;;  %v1496_v46 = vadd.s32 144, %v2536_v11  ;;  %v837_v48 = vpop.f32.mrf.mxu1 }
 0x195   : > { %v1221_v56 = vmul.f32 0.6931472, %v2022_v0  ;;  %v1070_v39 = vsub.f32 0.0, %v1038_v27  ;;  %v1497_v31 = vadd.s32 152, %v2536_v11  ;;  %v1049_v49 = vand.u32 2147483647, %v2680_v28 }
 0x196   : > { %v2024_v3 = vpop.eup %2023  ;;  %v941_v52 = vmax.f32 %v2662_v58, 0.0  ;;  %v1563_v5 = vmul.u32 4, %v1531_v45  ;;  %v1498_v9 = vadd.s32 160, %v2536_v11 }
 0x197   : > { %v1227_v34 = vsel %vm1226_vm5, %v1224_v54, %v1221_v56  ;;  %v1228_v24 = vadd.f32 1.0, %v2024_v3  ;;  %v1231_v7 = vmul.f32 -0.5, %v2024_v3  ;;  %v1234_v38 = vand.u32 2147483647, %v2024_v3 }
 0x198   : > { %v1451_v63 = vadd.f32 %v1227_v34, %v1003_v59  ;;  %v1112_v16 = vmul.f32 1.442695, %v1070_v39  ;;  %v973_v54 = vmul.f32 %v909_v42, %v2662_v58  ;;  %v1587_v59 = vadd.s32 %v1555_v43, %v2550_v33 }
 0x199   : > { %2025 = vlog2.f32 %v1228_v24  ;;  %v1232_v13 = vadd.f32 1.0, %v1231_v7  ;;  %vm1235_vm7 = vcmp.lt.f32.partialorder %v1234_v38, 0.0004427343  ;;  %v1488_v34 = vadd.s32 80, %v2536_v11 }
 0x19a   : > { %v1649_v35 = vsel %vm1617_vm6, %v1451_v63, 0.0  ;;  %2027 = vpow2.f32 %v1110_v8  ;;  %v1532_v63 = vadd.s32 %v2540_v26, %v1496_v46  ;;  %v1081_v1 = vsub.f32 0.0, %v1049_v49 }
 0x19b   : > { %v1689_v40 = vsel %vm380_vm2, %v1649_v35, 0.0  ;;  %v1233_v23 = vmul.f32 %v2024_v3, %v1232_v13  ;;  %v1533_v19 = vadd.s32 %v2540_v26, %v1497_v31  ;;  %v2700_v24 = vadd.f32 %v870_v12, %v2524_v57 }
 0x19c   : > { %v1690_v2 = vadd.f32 %v1689_v40, %v1688_v44  ;;  %v2683_v44 = vpop.f32.mrf.mxu3  ;;  %v2696_v40 = vadd.f32 %v837_v48, %v2524_v57  ;;  %vm1619_vm10 = vcmp.lt.s32.totalorder %v1587_v59, 8  ;;  %v1524_v8 = vadd.s32 %v2540_v26, %v1488_v34  ;;  %v840_v43 = vpop.f32.mrf.mxu1 }
 0x19d   : > { %v1564_v4 = vmul.u32 4, %v1532_v63  ;;  %v1134_v14 = vmul.f32 1.442695, %v1081_v1  ;;  %v1595_v18 = vadd.s32 %v1563_v5, %v2550_v33  ;;  %v1050_v20 = vand.u32 2147483647, %v2700_v24 }
 0x19e   : > { %v1039_v38 = vand.u32 2147483647, %v2696_v40  ;;  %v1534_v27 = vadd.s32 %v2540_v26, %v1498_v9  ;;  %v2719_v49 = vadd.f32 %v2683_v44, %v2524_v57  ;;  %v1489_v48 = vadd.s32 88, %v2536_v11 }
 0x19f   : > { %v2026_v62 = vpop.eup %2025  ;;  %v1596_v25 = vadd.s32 %v1564_v4, %v2550_v33  ;;  %vm1627_vm11 = vcmp.lt.s32.totalorder %v1595_v18, 8  ;;  %v1082_v45 = vsub.f32 0.0, %v1050_v20  ;;  %v1500_v9 = vadd.s32 176, %v2536_v11  ;;  %v911_v20 = vld [vmem:[%s2519_s10 + $0x58] sm:$0xff] }
 0x1a0   : > { %v2028_v21 = vpop.eup %2027  ;;  %v1230_v22 = vmul.f32 0.6931472, %v2026_v62  ;;  %v1565_v62 = vmul.u32 4, %v1533_v19 }
 0x1a1   : > { %v1237_v15 = vadd.f32 1.0, %v2028_v21  ;;  %v1240_v36 = vmul.f32 -0.5, %v2028_v21  ;;  %v1243_v56 = vand.u32 2147483647, %v2028_v21  ;;  %vm1628_vm12 = vcmp.lt.s32.totalorder %v1596_v25, 8 }
 0x1a2   : > { %v1236_v30 = vsel %vm1235_vm7, %v1233_v23, %v1230_v22  ;;  %v910_v22 = vld [vmem:[%s2519_s10 + $0x50] sm:$0xff]  ;;  %v1556_v23 = vmul.u32 4, %v1524_v8  ;;  %v1136_v44 = vmul.f32 1.442695, %v1082_v45  ;;  %v1660_v63 = vsel %vm1628_vm12, %v2627_v32, 0.0 }
 0x1a3   : > { %v1452_v41 = vadd.f32 %v1236_v30, %v1004_v29  ;;  %2029 = vlog2.f32 %v1237_v15  ;;  %v1241_v51 = vadd.f32 1.0, %v1240_v36  ;;  %vm1244_vm9 = vcmp.lt.f32.partialorder %v1243_v56, 0.0004427343 }
 0x1a4   : > { %2031 = vpow2.f32 %v1112_v16  ;;  %v2704_v53 = vpop.f32.mrf.mxu3  ;;  %v1071_v15 = vsub.f32 0.0, %v1039_v38  ;;  %v942_v36 = vmax.f32 %v2671_v37, 0.0  ;;  %v974_v39 = vmul.f32 %v910_v22, %v2671_v37 }
 0x1a5   : > { %v1650_v47 = vsel %vm1618_vm8, %v1452_v41, 0.0  ;;  %v1242_v3 = vmul.f32 %v2028_v21, %v1241_v51  ;;  %v1597_v16 = vadd.s32 %v1565_v62, %v2550_v33  ;;  %v1588_v46 = vadd.s32 %v1556_v23, %v2550_v33  ;;  %v843_v23 = vpop.f32.mrf.mxu1 }
 0x1a6   : > { %v1691_v50 = vsel %vm380_vm2, %v1650_v47, 0.0  ;;  %v1114_v42 = vmul.f32 1.442695, %v1071_v15  ;;  %v1566_v47 = vmul.u32 4, %v1534_v27  ;;  %v1499_v37 = vadd.s32 168, %v2536_v11  ;;  %v922_v15 = vld [vmem:[%s2519_s10 + $0xb0] sm:$0xff] }
 0x1a7   : > { %v1692_v0 = vadd.f32 %v1691_v50, %v1690_v2  ;;  %v1005_v2 = vsub.f32 %v941_v52, %v973_v54  ;;  %v1659_v52 = vsel %vm1627_vm11, %v2614_v60, 0.0  ;;  %v921_v54 = vld [vmem:[%s2519_s10 + $0xa8] sm:$0xff]  ;;  %v1006_v56 = vsub.f32 %v942_v36, %v974_v39 }
 0x1a8   : > { %vm1629_vm14 = vcmp.lt.s32.totalorder %v1597_v16, 8  ;;  %vm1620_vm15 = vcmp.lt.s32.totalorder %v1588_v46, 8  ;;  %v1598_v1 = vadd.s32 %v1566_v47, %v2550_v33  ;;  %v1051_v60 = vand.u32 2147483647, %v2719_v49 }
 0x1a9   : > { %v2030_v61 = vpop.eup %2029  ;;  %v985_v5 = vmul.f32 %v921_v54, %v2680_v28  ;;  %v1535_v19 = vadd.s32 %v2540_v26, %v1499_v37  ;;  %v1525_v32 = vadd.s32 %v2540_v26, %v1489_v48  ;;  %v2751_v18 = vsel %vm380_vm2, %v1660_v63, 0.0 }
 0x1aa   : > { %v1239_v35 = vmul.f32 0.6931472, %v2030_v61  ;;  %v2032_v58 = vpop.eup %2031  ;;  %vm1630_vm0 = vcmp.lt.s32.totalorder %v1598_v1, 8  ;;  %v2770_v46 = vadd.f32 %v843_v23, %v2524_v57  ;;  %v954_v54 = vmax.f32 %v2700_v24, 0.0 }
 0x1ab   : > { %v1246_v13 = vadd.f32 1.0, %v2032_v58  ;;  %v1249_v17 = vmul.f32 -0.5, %v2032_v58  ;;  %v1252_v41 = vand.u32 2147483647, %v2032_v58 }
 0x1ac   : > { %v1245_v7 = vsel %vm1244_vm9, %v1242_v3, %v1239_v35  ;;  %v2730_v61 = vpop.f32.mrf.mxu3  ;;  %v953_v3 = vmax.f32 %v2680_v28, 0.0  ;;  %v1083_v28 = vsub.f32 0.0, %v1051_v60  ;;  %v1041_v1 = vand.u32 2147483647, %v2770_v46 }
 0x1ad   : > { %v1453_v10 = vadd.f32 %v1245_v7, %v1005_v2  ;;  %2033 = vlog2.f32 %v1246_v13  ;;  %v1250_v30 = vadd.f32 1.0, %v1249_v17  ;;  %vm1253_vm13 = vcmp.lt.f32.partialorder %v1252_v41, 0.0004427343 }
 0x1ae   : > { %2035 = vpow2.f32 %v1134_v14  ;;  %v1661_v7 = vsel %vm1629_vm14, %v2642_v6, 0.0  ;;  %v2748_v6 = vsel %vm380_vm2, %v1659_v52, 0.0  ;;  %v2758_v27 = vsub.f32 %v953_v3, %v985_v5 }
 0x1af   : > { %v1651_v12 = vsel %vm1619_vm10, %v1453_v10, 0.0  ;;  %2037 = vpow2.f32 %v1114_v42  ;;  %v1251_v51 = vmul.f32 %v2032_v58, %v1250_v30  ;;  %v2756_v25 = vsel %vm380_vm2, %v1661_v7, 0.0 }
 0x1b0   : > { %v1693_v21 = vsel %vm380_vm2, %v1651_v12, 0.0  ;;  %2039 = vpow2.f32 %v1136_v44  ;;  %v1567_v12 = vmul.u32 4, %v1535_v19  ;;  %v1536_v30 = vadd.s32 %v2540_v26, %v1500_v9 }
 0x1b1   : > { %v1694_v29 = vadd.f32 %v1693_v21, %v1692_v0  ;;  %v2723_v0 = vadd.f32 %v840_v43, %v2524_v57  ;;  %v1557_v21 = vmul.u32 4, %v1525_v32  ;;  %v1138_v36 = vmul.f32 1.442695, %v1083_v28  ;;  %v912_v28 = vld [vmem:[%s2519_s10 + $0x60] sm:$0xff] }
 0x1b2   : > { %v943_v42 = vmax.f32 %v2696_v40, 0.0  ;;  %v975_v43 = vmul.f32 %v911_v20, %v2696_v40  ;;  %v2773_v47 = vadd.s32 %v1567_v12, %v2550_v33  ;;  %v1662_v52 = vsel %vm1630_vm0, %v2659_v55, 0.0 }
 0x1b3   : > { %v2034_v31 = vpop.eup %2033  ;;  %v1040_v2 = vand.u32 2147483647, %v2723_v0  ;;  %v1589_v37 = vadd.s32 %v1557_v21, %v2550_v33  ;;  %v1073_v32 = vsub.f32 0.0, %v1041_v1  ;;  %v923_v21 = vld [vmem:[%s2519_s10 + $0xb8] sm:$0xff] }
 0x1b4   : > { %v1248_v50 = vmul.f32 0.6931472, %v2034_v31  ;;  %v2728_v59 = vpop.eup %2035  ;;  %v2767_v45 = vpop.f32.mrf.mxu3  ;;  %vm1631_vm5 = vcmp.lt.s32.totalorder %v2773_v47, 8 }
 0x1b5   : > { %v2038_v58 = vpop.eup %2037  ;;  %v1345_v8 = vadd.f32 1.0, %v2728_v59  ;;  %v1072_v38 = vsub.f32 0.0, %v1040_v2  ;;  %v1348_v62 = vmul.f32 -0.5, %v2728_v59  ;;  %vm1621_vm4 = vcmp.lt.s32.totalorder %v1589_v37, 8 }
 0x1b6   : > { %v1254_v34 = vsel %vm1253_vm13, %v1251_v51, %v1248_v50  ;;  %v1255_v13 = vadd.f32 1.0, %v2038_v58  ;;  %v1258_v17 = vmul.f32 -0.5, %v2038_v58  ;;  %v2763_v41 = vpop.eup %2039  ;;  %v1261_v16 = vand.u32 2147483647, %v2038_v58 }
 0x1b7   : > { %v1454_v35 = vadd.f32 %v1254_v34, %v1006_v56  ;;  %v1116_v22 = vmul.f32 1.442695, %v1072_v38  ;;  %v1349_v31 = vadd.f32 1.0, %v1348_v62  ;;  %v1490_v50 = vadd.s32 96, %v2536_v11 }
 0x1b8   : > { %2041 = vlog2.f32 %v1255_v13  ;;  %v1259_v39 = vadd.f32 1.0, %v1258_v17  ;;  %v986_v56 = vmul.f32 %v922_v15, %v2700_v24  ;;  %v1354_v44 = vadd.f32 1.0, %v2763_v41 }
 0x1b9   : > { %v1652_v4 = vsel %vm1620_vm15, %v1454_v35, 0.0  ;;  %2043 = vlog2.f32 %v1345_v8  ;;  %v1568_v34 = vmul.u32 4, %v1536_v30  ;;  %v1007_v35 = vsub.f32 %v943_v42, %v975_v43 }
 0x1ba   : > { %v1695_v10 = vsel %vm380_vm2, %v1652_v4, 0.0  ;;  %2045 = vpow2.f32 %v1116_v22  ;;  %v1260_v60 = vmul.f32 %v2038_v58, %v1259_v39  ;;  %vm1262_vm3 = vcmp.lt.f32.partialorder %v1261_v16, 0.0004427343 }
 0x1bb   : > { %v2745_v14 = vadd.f32 %v1695_v10, %v1694_v29  ;;  %v1351_v29 = vand.u32 2147483647, %v2728_v59  ;;  %2047 = vpow2.f32 %v1138_v36  ;;  %v1350_v3 = vmul.f32 %v2728_v59, %v1349_v31  ;;  %v846_v31 = vpop.f32.mrf.mxu1 }
 0x1bc   : > { %v1526_v19 = vadd.s32 %v2540_v26, %v1490_v50  ;;  %v2791_v2 = vadd.f32 %v2704_v53, %v2524_v57  ;;  %2049 = vlog2.f32 %v1354_v44  ;;  %v1357_v8 = vmul.f32 -0.5, %v2763_v41 }
 0x1bd   : > { %vm2779_vm1 = vcmp.lt.f32.partialorder %v1351_v29, 0.0004427343  ;;  %v2795_v59 = vsel %vm380_vm2, %v1662_v52, 0.0  ;;  %v2798_v9 = vsub.f32 %v954_v54, %v986_v56  ;;  %v1501_v53 = vadd.s32 184, %v2536_v11  ;;  %v2811_v29 = vpop.f32.mrf.mxu3 }
 0x1be   : > { %v2042_v51 = vpop.eup %2041  ;;  %v1558_v17 = vmul.u32 4, %v1526_v19  ;;  %v1118_v38 = vmul.f32 1.442695, %v1073_v32  ;;  %v1360_v20 = vand.u32 2147483647, %v2763_v41  ;;  %v1358_v15 = vadd.f32 1.0, %v1357_v8 }
 0x1bf   : > { %v2044_v48 = vpop.eup %2043  ;;  %v1257_v63 = vmul.f32 0.6931472, %v2042_v51  ;;  %v1052_v22 = vand.u32 2147483647, %v2791_v2  ;;  %v2814_v30 = vadd.s32 %v1568_v34, %v2550_v33  ;;  %v955_v36 = vmax.f32 %v2719_v49, 0.0 }
 0x1c0   : > { %v2046_v55 = vpop.eup %2045  ;;  %v1347_v24 = vmul.f32 0.6931472, %v2044_v48  ;;  %v944_v42 = vmax.f32 %v2723_v0, 0.0  ;;  %v976_v43 = vmul.f32 %v912_v28, %v2723_v0  ;;  %v1590_v52 = vadd.s32 %v1558_v17, %v2550_v33 }
 0x1c1   : > { %v1263_v5 = vsel %vm1262_vm3, %v1260_v60, %v1257_v63  ;;  %v1264_v58 = vadd.f32 1.0, %v2046_v55  ;;  %v1267_v4 = vmul.f32 -0.5, %v2046_v55  ;;  %v2803_v12 = vpop.eup %2047  ;;  %v1270_v16 = vand.u32 2147483647, %v2046_v55 }
 0x1c2   : > { %v1455_v7 = vadd.f32 %v1263_v5, %v1007_v35  ;;  %v1353_v62 = vsel %vm2779_vm1, %v1350_v3, %v1347_v24  ;;  %v2050_v37 = vpop.eup %2049  ;;  %v1363_v51 = vadd.f32 1.0, %v2803_v12  ;;  %vm2823_vm6 = vcmp.lt.f32.partialorder %v1360_v20, 0.0004427343 }
 0x1c3   : > { %2051 = vlog2.f32 %v1264_v58  ;;  %v1268_v39 = vadd.f32 1.0, %v1267_v4  ;;  %v1465_v50 = vadd.f32 %v1353_v62, %v2758_v27  ;;  %v1537_v56 = vadd.s32 %v2540_v26, %v1501_v53  ;;  %v913_v62 = vld [vmem:[%s2519_s10 + $0x68] sm:$0xff]  ;;  %v849_v54 = vpop.f32.mrf.mxu1 }
 0x1c4   : > { %v1653_v10 = vsel %vm1621_vm4, %v1455_v7, 0.0  ;;  %2053 = vpow2.f32 %v1118_v38  ;;  %v1084_v0 = vsub.f32 0.0, %v1052_v22  ;;  %v1491_v48 = vadd.s32 104, %v2536_v11 }
 0x1c5   : > { %v1697_v13 = vsel %vm380_vm2, %v1653_v10, 0.0  ;;  %v2831_v44 = vadd.f32 %v2730_v61, %v2524_v57  ;;  %v2834_v34 = vadd.f32 %v846_v31, %v2524_v57  ;;  %v1356_v63 = vmul.f32 0.6931472, %v2050_v37  ;;  %v924_v37 = vld [vmem:[%s2519_s10 + $0xc0] sm:$0xff] }
 0x1c6   : > { %v1698_v23 = vadd.f32 %v1697_v13, %v2745_v14  ;;  %v987_v14 = vmul.f32 %v923_v21, %v2719_v49  ;;  %v1269_v49 = vmul.f32 %v2046_v55, %v1268_v39  ;;  %v1359_v60 = vmul.f32 %v2763_v41, %v1358_v15  ;;  %v2845_v13 = vpop.f32.mrf.mxu3 }
 0x1c7   : > { %v1008_v35 = vsub.f32 %v944_v42, %v976_v43  ;;  %vm1271_vm7 = vcmp.lt.f32.partialorder %v1270_v16, 0.0004427343  ;;  %2055 = vlog2.f32 %v1363_v51  ;;  %v1366_v1 = vmul.f32 -0.5, %v2803_v12 }
 0x1c8   : > { %vm1622_vm8 = vcmp.lt.s32.totalorder %v1590_v52, 8  ;;  %vm1632_vm9 = vcmp.lt.s32.totalorder %v2814_v30, 8  ;;  %v1140_v61 = vmul.f32 1.442695, %v1084_v0  ;;  %v1527_v55 = vadd.s32 %v2540_v26, %v1491_v48 }
 0x1c9   : > { %v2052_v40 = vpop.eup %2051  ;;  %v1042_v24 = vand.u32 2147483647, %v2834_v34  ;;  %v1663_v41 = vsel %vm1631_vm5, %v1465_v50, 0.0  ;;  %v1569_v7 = vmul.u32 4, %v1537_v56  ;;  %v1053_v58 = vand.u32 2147483647, %v2831_v44 }
 0x1ca   : > { %v1266_v27 = vmul.f32 0.6931472, %v2052_v40  ;;  %v2054_v5 = vpop.eup %2053  ;;  %v1502_v4 = vadd.s32 192, %v2536_v11  ;;  %v1362_v28 = vsel %vm2823_vm6, %v1359_v60, %v1356_v63  ;;  %v1367_v17 = vadd.f32 1.0, %v1366_v1 }
 0x1cb   : > { %v1273_v8 = vadd.f32 1.0, %v2054_v5  ;;  %v1276_v10 = vmul.f32 -0.5, %v2054_v5  ;;  %v1074_v53 = vsub.f32 0.0, %v1042_v24  ;;  %v1559_v20 = vmul.u32 4, %v1527_v55 }
 0x1cc   : > { %v1272_v3 = vsel %vm1271_vm7, %v1269_v49, %v1266_v27  ;;  %v2854_v15 = vsel %vm380_vm2, %v1663_v41, 0.0  ;;  %v1019_v39 = vsub.f32 %v955_v36, %v987_v14  ;;  %v1369_v42 = vand.u32 2147483647, %v2803_v12 }
 0x1cd   : > { %v1456_v19 = vadd.f32 %v1272_v3, %v1008_v35  ;;  %2057 = vlog2.f32 %v1273_v8  ;;  %v1120_v21 = vmul.f32 1.442695, %v1074_v53  ;;  %v2056_v22 = vpop.eup %2055  ;;  %v1085_v43 = vsub.f32 0.0, %v1053_v58 }
 0x1ce   : > { %2059 = vpow2.f32 %v1140_v61  ;;  %v1466_v16 = vadd.f32 %v1362_v28, %v2798_v9  ;;  %v2859_v31 = vadd.s32 %v1569_v7, %v2550_v33  ;;  %v1277_v50 = vadd.f32 1.0, %v1276_v10  ;;  %v2889_v41 = vpop.f32.mrf.mxu3 }
 0x1cf   : > { %v1654_v32 = vsel %vm1622_vm8, %v1456_v19, 0.0  ;;  %2061 = vpow2.f32 %v1120_v21  ;;  %v945_v51 = vmax.f32 %v2770_v46, 0.0  ;;  %v977_v52 = vmul.f32 %v913_v62, %v2770_v46  ;;  %v914_v62 = vld [vmem:[%s2519_s10 + $0x70] sm:$0xff] }
 0x1d0   : > { %v1699_v47 = vsel %vm380_vm2, %v1654_v32, 0.0  ;;  %v1279_v40 = vand.u32 2147483647, %v2054_v5  ;;  %v1365_v36 = vmul.f32 0.6931472, %v2056_v22  ;;  %v1368_v14 = vmul.f32 %v2803_v12, %v1367_v17 }
 0x1d1   : > { %v2850_v38 = vadd.f32 %v1699_v47, %v1698_v23  ;;  %v1538_v23 = vadd.s32 %v2540_v26, %v1502_v4  ;;  %v1591_v56 = vadd.s32 %v1559_v20, %v2550_v33  ;;  %v1492_v9 = vadd.s32 112, %v2536_v11 }
 0x1d2   : > { %vm2868_vm10 = vcmp.lt.f32.partialorder %v1369_v42, 0.0004427343  ;;  %v956_v27 = vmax.f32 %v2791_v2, 0.0  ;;  %v988_v49 = vmul.f32 %v924_v37, %v2791_v2  ;;  %v1142_v63 = vmul.f32 1.442695, %v1085_v43  ;;  %v925_v43 = vld [vmem:[%s2519_s10 + $0xc8] sm:$0xff] }
 0x1d3   : > { %v2058_v0 = vpop.eup %2057  ;;  %vm1633_vm11 = vcmp.lt.s32.totalorder %v2859_v31, 8  ;;  %v2879_v12 = vadd.f32 %v2767_v45, %v2524_v57  ;;  %v1278_v35 = vmul.f32 %v2054_v5, %v1277_v50  ;;  %v2882_v1 = vadd.f32 %v849_v54, %v2524_v57 }
 0x1d4   : > { %v2874_v46 = vpop.eup %2059  ;;  %v1275_v60 = vmul.f32 0.6931472, %v2058_v0  ;;  %v1664_v3 = vsel %vm1632_vm9, %v1466_v16, 0.0  ;;  %v1570_v61 = vmul.u32 4, %v1538_v23  ;;  %v1009_v19 = vsub.f32 %v945_v51, %v977_v52 }
 0x1d5   : > { %vm1280_vm12 = vcmp.lt.f32.partialorder %v1279_v40, 0.0004427343  ;;  %v2062_v2 = vpop.eup %2061  ;;  %v1371_v55 = vsel %vm2868_vm10, %v1368_v14, %v1365_v36  ;;  %vm1623_vm13 = vcmp.lt.s32.totalorder %v1591_v56, 8  ;;  %v1528_v45 = vadd.s32 %v2540_v26, %v1492_v9  ;;  %v852_v9 = vpop.f32.mrf.mxu1 }
 0x1d6   : > { %v1281_v24 = vsel %vm1280_vm12, %v1278_v35, %v1275_v60  ;;  %v1372_v5 = vadd.f32 1.0, %v2874_v46  ;;  %v1503_v7 = vadd.s32 200, %v2536_v11  ;;  %v1282_v58 = vadd.f32 1.0, %v2062_v2 }
 0x1d7   : > { %v1457_v30 = vadd.f32 %v1281_v24, %v1009_v19  ;;  %2063 = vpow2.f32 %v1142_v63  ;;  %v1054_v8 = vand.u32 2147483647, %v2879_v12  ;;  %v1285_v4 = vmul.f32 -0.5, %v2062_v2 }
 0x1d8   : > { %v1043_v32 = vand.u32 2147483647, %v2882_v1  ;;  %v2896_v10 = vsel %vm380_vm2, %v1664_v3, 0.0  ;;  %v2898_v53 = vsub.f32 %v956_v27, %v988_v49  ;;  %2065 = vlog2.f32 %v1282_v58  ;;  %v894_v3 = vpop.f32.mrf.mxu3 }
 0x1d9   : > { %v1655_v28 = vsel %vm1623_vm13, %v1457_v30, 0.0  ;;  %v2901_v17 = vadd.s32 %v1570_v61, %v2550_v33  ;;  %v1560_v20 = vmul.u32 4, %v1528_v45  ;;  %v1467_v22 = vadd.f32 %v1371_v55, %v1019_v39 }
 0x1da   : > { %v1701_v47 = vsel %vm380_vm2, %v1655_v28, 0.0  ;;  %v1075_v21 = vsub.f32 0.0, %v1043_v32  ;;  %v1375_v42 = vmul.f32 -0.5, %v2874_v46  ;;  %v1539_v16 = vadd.s32 %v2540_v26, %v1503_v7 }
 0x1db   : > { %v1702_v37 = vadd.f32 %v1701_v47, %v2850_v38  ;;  %2067 = vlog2.f32 %v1372_v5  ;;  %v1086_v50 = vsub.f32 0.0, %v1054_v8  ;;  %v1286_v23 = vadd.f32 1.0, %v1285_v4 }
 0x1dc   : > { %v1122_v51 = vmul.f32 1.442695, %v1075_v21  ;;  %v2911_v52 = vadd.f32 %v2811_v29, %v2524_v57  ;;  %v946_v40 = vmax.f32 %v2834_v34, 0.0  ;;  %v978_v54 = vmul.f32 %v914_v62, %v2834_v34 }
 0x1dd   : > { %v1288_v39 = vand.u32 2147483647, %v2062_v2  ;;  %v2915_v36 = vpop.eup %2063  ;;  %v957_v14 = vmax.f32 %v2831_v44, 0.0  ;;  %v989_v56 = vmul.f32 %v925_v43, %v2831_v44  ;;  %v1592_v38 = vadd.s32 %v1560_v20, %v2550_v33 }
 0x1de   : > { %2069 = vpow2.f32 %v1122_v51  ;;  %v2066_v0 = vpop.eup %2065  ;;  %v1665_v29 = vsel %vm1633_vm11, %v1467_v22, 0.0  ;;  %v1376_v48 = vadd.f32 1.0, %v1375_v42  ;;  %v1378_v27 = vand.u32 2147483647, %v2874_v46  ;;  %v926_v22 = vld [vmem:[%s2519_s10 + $0xd0] sm:$0xff]  ;;  %v915_v51 = vld [vmem:[%s2519_s10 + $0x78] sm:$0xff] }
 0x1df   : > { %v1571_v49 = vmul.u32 4, %v1539_v16  ;;  %v1144_v34 = vmul.f32 1.442695, %v1086_v50  ;;  %v1284_v63 = vmul.f32 0.6931472, %v2066_v0  ;;  %v1287_v60 = vmul.f32 %v2062_v2, %v1286_v23 }
 0x1e0   : > { %v1493_v35 = vadd.s32 120, %v2536_v11  ;;  %v1055_v44 = vand.u32 2147483647, %v2911_v52  ;;  %v1010_v61 = vsub.f32 %v946_v40, %v978_v54  ;;  %vm1289_vm14 = vcmp.lt.f32.partialorder %v1288_v39, 0.0004427343 }
 0x1e1   : > { %v2926_v19 = vadd.f32 %v852_v9, %v2524_v57  ;;  %v2068_v55 = vpop.eup %2067  ;;  %v2929_v31 = vsel %vm380_vm2, %v1665_v29, 0.0  ;;  %v1381_v24 = vadd.f32 1.0, %v2915_v36  ;;  %v1290_v45 = vsel %vm1289_vm14, %v1287_v60, %v1284_v63 }
 0x1e2   : > { %vm1624_vm15 = vcmp.lt.s32.totalorder %v1592_v38, 8  ;;  %vm2932_vm0 = vcmp.lt.f32.partialorder %v1378_v27, 0.0004427343  ;;  %v2936_v5 = vsub.f32 %v957_v14, %v989_v56  ;;  %v1458_v7 = vadd.f32 %v1290_v45, %v1010_v61 }
 0x1e3   : > { %v2940_v30 = vadd.f32 %v2845_v13, %v2524_v57  ;;  %v2943_v8 = vadd.s32 %v1571_v49, %v2550_v33  ;;  %2071 = vpow2.f32 %v1144_v34  ;;  %v1529_v4 = vadd.s32 %v2540_v26, %v1493_v35 }
 0x1e4   : > { %v2070_v58 = vpop.eup %2069  ;;  %v1044_v32 = vand.u32 2147483647, %v2926_v19  ;;  %v1377_v28 = vmul.f32 %v2874_v46, %v1376_v48  ;;  %v1087_v47 = vsub.f32 0.0, %v1055_v44  ;;  %v1656_v62 = vsel %vm1624_vm15, %v1458_v7, 0.0 }
 0x1e5   : > { %v1291_v20 = vadd.f32 1.0, %v2070_v58  ;;  %v1374_v21 = vmul.f32 0.6931472, %v2068_v55  ;;  %2073 = vlog2.f32 %v1381_v24  ;;  %v1703_v13 = vsel %vm380_vm2, %v1656_v62, 0.0 }
 0x1e6   : > { %v1294_v42 = vmul.f32 -0.5, %v2070_v58  ;;  %v958_v43 = vmax.f32 %v2879_v12, 0.0  ;;  %v2951_v16 = vadd.f32 %v1703_v13, %v1702_v37  ;;  %v1056_v50 = vand.u32 2147483647, %v2940_v30 }
 0x1e7   : > { %2075 = vlog2.f32 %v1291_v20  ;;  %v1384_v23 = vmul.f32 -0.5, %v2915_v36  ;;  %v1561_v46 = vmul.u32 4, %v1529_v4  ;;  %v2958_v40 = vadd.f32 %v2889_v41, %v2524_v57  ;;  %v897_v41 = vpop.f32.mrf.mxu3 }
 0x1e8   : > { %v1076_v54 = vsub.f32 0.0, %v1044_v32  ;;  %v1387_v39 = vand.u32 2147483647, %v2915_v36  ;;  %v990_v14 = vmul.f32 %v926_v22, %v2879_v12  ;;  %v1504_v56 = vadd.s32 208, %v2536_v11 }
 0x1e9   : > { %v1146_v37 = vmul.f32 1.442695, %v1087_v47  ;;  %v2963_v38 = vpop.eup %2071  ;;  %v1380_v9 = vsel %vm2932_vm0, %v1377_v28, %v1374_v21  ;;  %v1295_v0 = vadd.f32 1.0, %v1294_v42  ;;  %v2968_v48 = vadd.f32 %v894_v3, %v2524_v57 }
 0x1ea   : > { %v1124_v29 = vmul.f32 1.442695, %v1076_v54  ;;  %vm1634_vm1 = vcmp.lt.s32.totalorder %v2901_v17, 8  ;;  %v1088_v27 = vsub.f32 0.0, %v1056_v50  ;;  %v947_v49 = vmax.f32 %v2882_v1, 0.0 }
 0x1eb   : > { %v979_v34 = vmul.f32 %v915_v51, %v2882_v1  ;;  %v1297_v63 = vand.u32 2147483647, %v2070_v58  ;;  %v2074_v60 = vpop.eup %2073  ;;  %v1385_v35 = vadd.f32 1.0, %v1384_v23  ;;  %v1593_v44 = vadd.s32 %v1561_v46, %v2550_v33 }
 0x1ec   : > { %v1057_v61 = vand.u32 2147483647, %v2958_v40  ;;  %2077 = vpow2.f32 %v1124_v29  ;;  %v1390_v3 = vadd.f32 1.0, %v2963_v38  ;;  %v1540_v24 = vadd.s32 %v2540_v26, %v1504_v56 }
 0x1ed   : > { %v2076_v55 = vpop.eup %2075  ;;  %2079 = vpow2.f32 %v1146_v37  ;;  %v2978_v45 = vadd.f32 %v897_v41, %v2524_v57  ;;  %v1296_v1 = vmul.f32 %v2070_v58, %v1295_v0  ;;  %v1494_v7 = vadd.s32 128, %v2536_v11 }
 0x1ee   : > { %v1293_v2 = vmul.f32 0.6931472, %v2076_v55  ;;  %v1058_v4 = vand.u32 2147483647, %v2968_v48  ;;  %v1383_v32 = vmul.f32 0.6931472, %v2074_v60  ;;  %v1011_v47 = vsub.f32 %v947_v49, %v979_v34 }
 0x1ef   : > { %v1148_v28 = vmul.f32 1.442695, %v1088_v27  ;;  %vm1298_vm3 = vcmp.lt.f32.partialorder %v1297_v63, 0.0004427343  ;;  %vm1625_vm4 = vcmp.lt.s32.totalorder %v1593_v44, 8  ;;  %v1089_v20 = vsub.f32 0.0, %v1057_v61 }
 0x1f0   : > { %v1299_v62 = vsel %vm1298_vm3, %v1296_v1, %v1293_v2  ;;  %v1059_v21 = vand.u32 2147483647, %v2978_v45  ;;  %v1468_v22 = vadd.f32 %v1380_v9, %v2898_v53  ;;  %v1386_v57 = vmul.f32 %v2915_v36, %v1385_v35  ;;  %v916_v49 = vld [vmem:[%s2519_s10 + $0x80] sm:$0xff] }
 0x1f1   : > { %vm2985_vm5 = vcmp.lt.f32.partialorder %v1387_v39, 0.0004427343  ;;  %v1459_v58 = vadd.f32 %v1299_v62, %v1011_v47  ;;  %2081 = vlog2.f32 %v1390_v3  ;;  %v1572_v50 = vmul.u32 4, %v1540_v24 }
 0x1f2   : > { %v2078_v42 = vpop.eup %2077  ;;  %v1530_v23 = vadd.s32 %v2540_v26, %v1494_v7  ;;  %v1090_v51 = vsub.f32 0.0, %v1058_v4  ;;  %v1389_v53 = vsel %vm2985_vm5, %v1386_v57, %v1383_v32  ;;  %2083 = vpow2.f32 %v1148_v28 }
 0x1f3   : > { %v2991_v46 = vpop.eup %2079  ;;  %v1657_v36 = vsel %vm1625_vm4, %v1459_v58, 0.0  ;;  %v1300_v54 = vadd.f32 1.0, %v2078_v42  ;;  %v1150_v56 = vmul.f32 1.442695, %v1089_v20  ;;  %v1303_v37 = vmul.f32 -0.5, %v2078_v42 }
 0x1f4   : > { %v1705_v39 = vsel %vm380_vm2, %v1657_v36, 0.0  ;;  %v1091_v9 = vsub.f32 0.0, %v1059_v21  ;;  %vm1635_vm6 = vcmp.lt.s32.totalorder %v2943_v8, 8  ;;  %v3000_v0 = vsub.f32 %v958_v43, %v990_v14 }
 0x1f5   : > { %v3003_v29 = vadd.f32 %v1705_v39, %v2951_v16  ;;  %2085 = vlog2.f32 %v1300_v54  ;;  %v1666_v41 = vsel %vm1634_vm1, %v1468_v22, 0.0  ;;  %v3013_v27 = vadd.s32 %v1572_v50, %v2550_v33  ;;  %v927_v16 = vld [vmem:[%s2519_s10 + $0xd8] sm:$0xff] }
 0x1f6   : > { %v1562_v34 = vmul.u32 4, %v1530_v23  ;;  %v1152_v63 = vmul.f32 1.442695, %v1090_v51  ;;  %v1469_v12 = vadd.f32 %v1389_v53, %v2936_v5  ;;  %v1393_v43 = vmul.f32 -0.5, %v2963_v38 }
 0x1f7   : > { %v1399_v14 = vadd.f32 1.0, %v2991_v46  ;;  %v1505_v60 = vadd.s32 216, %v2536_v11  ;;  %v2082_v35 = vpop.eup %2081  ;;  %v959_v17 = vmax.f32 %v2911_v52, 0.0  ;;  %2087 = vpow2.f32 %v1150_v56 }
 0x1f8   : > { %v1304_v44 = vadd.f32 1.0, %v1303_v37  ;;  %v1154_v61 = vmul.f32 1.442695, %v1091_v9  ;;  %v3022_v55 = vpop.eup %2083  ;;  %v1396_v3 = vand.u32 2147483647, %v2963_v38  ;;  %v948_v24 = vmax.f32 %v2926_v19, 0.0 }
 0x1f9   : > { %v980_v5 = vmul.f32 %v916_v49, %v2926_v19  ;;  %v1306_v2 = vand.u32 2147483647, %v2078_v42  ;;  %v991_v1 = vmul.f32 %v927_v16, %v2911_v52  ;;  %v1506_v7 = vadd.s32 224, %v2536_v11 }
 0x1fa   : > { %v1594_v4 = vadd.s32 %v1562_v34, %v2550_v33  ;;  %2089 = vpow2.f32 %v1152_v63  ;;  %v1667_v28 = vsel %vm1635_vm6, %v1469_v12, 0.0  ;;  %v1394_v47 = vadd.f32 1.0, %v1393_v43  ;;  %v928_v12 = vld [vmem:[%s2519_s10 + $0xe0] sm:$0xff] }
 0x1fb   : > { %v2086_v32 = vpop.eup %2085  ;;  %2091 = vlog2.f32 %v1399_v14  ;;  %v1541_v62 = vadd.s32 %v2540_v26, %v1505_v60  ;;  %v1392_v20 = vmul.f32 0.6931472, %v2082_v35  ;;  %v1305_v19 = vmul.f32 %v2078_v42, %v1304_v44 }
 0x1fc   : > { %v1302_v21 = vmul.f32 0.6931472, %v2086_v32  ;;  %2093 = vpow2.f32 %v1154_v61  ;;  %v1402_v52 = vmul.f32 -0.5, %v2991_v46  ;;  %v1408_v22 = vadd.f32 1.0, %v3022_v55 }
 0x1fd   : > { %v1012_v8 = vsub.f32 %v948_v24, %v980_v5  ;;  %vm1307_vm7 = vcmp.lt.f32.partialorder %v1306_v2, 0.0004427343  ;;  %v3041_v57 = vpop.eup %2087  ;;  %v1542_v13 = vadd.s32 %v2540_v26, %v1506_v7  ;;  %vm1626_vm8 = vcmp.lt.s32.totalorder %v1594_v4, 8  ;;  %v929_v5 = vld [vmem:[%s2519_s10 + $0xe8] sm:$0xff] }
 0x1fe   : > { %v1308_v58 = vsel %vm1307_vm7, %v1305_v19, %v1302_v21  ;;  %v3045_v42 = vsel %vm380_vm2, %v1666_v41, 0.0  ;;  %v1395_v50 = vmul.f32 %v2963_v38, %v1394_v47  ;;  %v1573_v23 = vmul.u32 4, %v1541_v62 }
 0x1ff   : > { %v1460_v51 = vadd.f32 %v1308_v58, %v1012_v8  ;;  %v2188_v53 = vmov 0.0   ;;  %v3053_v54 = vsel %vm380_vm2, %v1667_v28, 0.0  ;;  %vm3055_vm9 = vcmp.lt.f32.partialorder %v1396_v3, 0.0004427343 }
 0x200   : > { %381 = vst.msk [vmem:[%s3037_s11] sm:$0xff] %vm380_vm2, %v2188_v53  ;;  %v3050_v36 = vpop.eup %2089  ;;  %vm1636_vm10 = vcmp.lt.s32.totalorder %v3013_v27, 8  ;;  %v1023_v56 = vsub.f32 %v959_v17, %v991_v1  ;;  %v1398_v38 = vsel %vm3055_vm9, %v1395_v50, %v1392_v20  ;;  %2095 = vlog2.f32 %v1408_v22 }
 0x201   : > { %v2092_v37 = vpop.eup %2091  ;;  %v1417_v9 = vadd.f32 1.0, %v3041_v57  ;;  %v1658_v41 = vsel %vm1626_vm8, %v1460_v51, 0.0  ;;  %v1403_v34 = vadd.f32 1.0, %v1402_v52  ;;  %v1405_v63 = vand.u32 2147483647, %v2991_v46 }
 0x202   : > { %v3064_v49 = vpop.eup %2093  ;;  %v1574_v43 = vmul.u32 4, %v1542_v13  ;;  %v1707_v16 = vsel %vm380_vm2, %v1658_v41, 0.0  ;;  %v3070_v14 = vadd.s32 %v1573_v23, %v2550_v33  ;;  %v1507_v60 = vadd.s32 232, %v2536_v11 }
 0x203   : > { %v1708_v35 = vadd.f32 %v1707_v16, %v3003_v29  ;;  %v1426_v17 = vadd.f32 1.0, %v3050_v36  ;;  %v1470_v44 = vadd.f32 %v1398_v38, %v3000_v0  ;;  %v1401_v61 = vmul.f32 0.6931472, %v2092_v37  ;;  %v930_v37 = vld [vmem:[%s2519_s10 + $0xf0] sm:$0xff] }
 0x204   : > { %v960_v3 = vmax.f32 %v2940_v30, 0.0  ;;  %v1411_v24 = vmul.f32 -0.5, %v3022_v55  ;;  %v992_v2 = vmul.f32 %v928_v12, %v2940_v30  ;;  %2097 = vlog2.f32 %v1417_v9 }
 0x205   : > { %v1710_v1 = vadd.f32 %v2748_v6, %v1708_v35  ;;  %v1435_v7 = vadd.f32 1.0, %v3064_v49  ;;  %v1404_v4 = vmul.f32 %v2991_v46, %v1403_v34  ;;  %vm3083_vm11 = vcmp.lt.f32.partialorder %v1405_v63, 0.0004427343 }
 0x206   : > { %v3088_v0 = vadd.s32 %v1574_v43, %v2550_v33  ;;  %v961_v32 = vmax.f32 %v2958_v40, 0.0  ;;  %v2096_v28 = vpop.eup %2095  ;;  %v993_v47 = vmul.f32 %v929_v5, %v2958_v40  ;;  %v1543_v30 = vadd.s32 %v2540_v26, %v1507_v60 }
 0x207   : > { %v1712_v6 = vadd.f32 %v2751_v18, %v1710_v1  ;;  %2099 = vlog2.f32 %v1426_v17  ;;  %v1407_v46 = vsel %vm3083_vm11, %v1404_v4, %v1401_v61  ;;  %v1412_v62 = vadd.f32 1.0, %v1411_v24 }
 0x208   : > { %v1420_v20 = vmul.f32 -0.5, %v3041_v57  ;;  %v1508_v21 = vadd.s32 240, %v2536_v11  ;;  %v1668_v19 = vsel %vm1636_vm10, %v1470_v44, 0.0  ;;  %vm1637_vm12 = vcmp.lt.s32.totalorder %v3070_v14, 8 }
 0x209   : > { %v1414_v40 = vand.u32 2147483647, %v3022_v55  ;;  %v1714_v52 = vadd.f32 %v2756_v25, %v1712_v6  ;;  %2101 = vlog2.f32 %v1435_v7  ;;  %v1024_v18 = vsub.f32 %v960_v3, %v992_v2  ;;  %v931_v3 = vld [vmem:[%s2519_s10 + $0xf8] sm:$0xff] }
 0x20a   : > { %v1410_v22 = vmul.f32 0.6931472, %v2096_v28  ;;  %v1429_v8 = vmul.f32 -0.5, %v3050_v36  ;;  %v1509_v13 = vadd.s32 248, %v2536_v11  ;;  %v2098_v58 = vpop.eup %2097  ;;  %v1471_v50 = vadd.f32 %v1407_v46, %v1023_v56 }
 0x20b   : > { %v1025_v23 = vsub.f32 %v961_v32, %v993_v47  ;;  %v1575_v51 = vmul.u32 4, %v1543_v30  ;;  %v1716_v27 = vadd.f32 %v2795_v59, %v1714_v52  ;;  %v1413_v53 = vmul.f32 %v3022_v55, %v1412_v62 }
 0x20c   : > { %vm1638_vm13 = vcmp.lt.s32.totalorder %v3088_v0, 8  ;;  %v1421_v39 = vadd.f32 1.0, %v1420_v20  ;;  %v1544_v25 = vadd.s32 %v2540_v26, %v1508_v21  ;;  %v1438_v38 = vmul.f32 -0.5, %v3064_v49 }
 0x20d   : > { %v2100_v9 = vpop.eup %2099  ;;  %vm3111_vm14 = vcmp.lt.f32.partialorder %v1414_v40, 0.0004427343  ;;  %v1423_v11 = vand.u32 2147483647, %v3041_v57  ;;  %v1718_v59 = vadd.f32 %v2854_v15, %v1716_v27  ;;  %v962_v55 = vmax.f32 %v2968_v48, 0.0 }
 0x20e   : > { %v1416_v56 = vsel %vm3111_vm14, %v1413_v53, %v1410_v22  ;;  %v1419_v34 = vmul.f32 0.6931472, %v2098_v58  ;;  %v1430_v63 = vadd.f32 1.0, %v1429_v8  ;;  %v1545_v12 = vadd.s32 %v2540_v26, %v1509_v13 }
 0x20f   : > { %v2102_v43 = vpop.eup %2101  ;;  %v1607_v16 = vadd.s32 %v1575_v51, %v2550_v33  ;;  %v1720_v60 = vadd.f32 %v2896_v10, %v1718_v59  ;;  %v994_v35 = vmul.f32 %v930_v37, %v2968_v48  ;;  %v1432_v17 = vand.u32 2147483647, %v3050_v36 }
 0x210   : > { %v1422_v15 = vmul.f32 %v3041_v57, %v1421_v39  ;;  %v1428_v44 = vmul.f32 0.6931472, %v2100_v9  ;;  %v1576_v61 = vmul.u32 4, %v1544_v25  ;;  %v1439_v24 = vadd.f32 1.0, %v1438_v38 }
 0x211   : > { %v1472_v5 = vadd.f32 %v1416_v56, %v1024_v18  ;;  %vm1424_vm15 = vcmp.lt.f32.partialorder %v1423_v11, 0.0004427343  ;;  %v1722_v2 = vadd.f32 %v2929_v31, %v1720_v60  ;;  %v1441_v26 = vand.u32 2147483647, %v3064_v49 }
 0x212   : > { %v1425_v1 = vsel %vm1424_vm15, %v1422_v15, %v1419_v34  ;;  %v1431_v7 = vmul.f32 %v3050_v36, %v1430_v63  ;;  %v1437_v10 = vmul.f32 0.6931472, %v2102_v43  ;;  %v1577_v4 = vmul.u32 4, %v1545_v12 }
 0x213   : > { %vm3130_vm0 = vcmp.lt.f32.partialorder %v1432_v17, 0.0004427343  ;;  %v1724_v57 = vadd.f32 %v3045_v42, %v1722_v2  ;;  %v963_v29 = vmax.f32 %v2978_v45, 0.0  ;;  %v995_v32 = vmul.f32 %v931_v3, %v2978_v45 }
 0x214   : > { %v1669_v31 = vsel %vm1637_vm12, %v1471_v50, 0.0  ;;  %v1434_v28 = vsel %vm3130_vm0, %v1431_v7, %v1428_v44  ;;  %v1608_v36 = vadd.s32 %v1576_v61, %v2550_v33  ;;  %v1440_v47 = vmul.f32 %v3064_v49, %v1439_v24 }
 0x215   : > { %v1473_v30 = vadd.f32 %v1425_v1, %v1025_v23  ;;  %v1026_v6 = vsub.f32 %v962_v55, %v994_v35  ;;  %v1726_v46 = vadd.f32 %v3053_v54, %v1724_v57  ;;  %vm1442_vm1 = vcmp.lt.f32.partialorder %v1441_v26, 0.0004427343  ;;  %v1674_v23 = vld [vmem:[%s3037_s11] sm:$0xff] }
 0x216   : > { %v1727_v42 = vsel %vm380_vm2, %v1668_v19, 0.0  ;;  %vm1639_vm3 = vcmp.lt.s32.totalorder %v1607_v16, 8  ;;  %v1443_v62 = vsel %vm1442_vm1, %v1440_v47, %v1437_v10  ;;  %v1609_v45 = vadd.s32 %v1577_v4, %v2550_v33 }
 0x217   : > { %v1670_v14 = vsel %vm1638_vm13, %v1472_v5, 0.0  ;;  %v1474_v20 = vadd.f32 %v1434_v28, %v1026_v6  ;;  %v1728_v21 = vadd.f32 %v1727_v42, %v1726_v46  ;;  %v1027_v40 = vsub.f32 %v963_v29, %v995_v32 }
 0x218   : > { %v1729_v49 = vsel %vm380_vm2, %v1669_v31, 0.0  ;;  %vm1640_vm4 = vcmp.lt.s32.totalorder %v1608_v36, 8  ;;  %v1671_v52 = vsel %vm1639_vm3, %v1473_v30, 0.0  ;;  %v1731_v19 = vsel %vm380_vm2, %v1670_v14, 0.0 }
 0x219   : > { %v1730_v54 = vadd.f32 %v1729_v49, %v1728_v21  ;;  %v1475_v18 = vadd.f32 %v1443_v62, %v1027_v40  ;;  %vm1641_vm5 = vcmp.lt.s32.totalorder %v1609_v45, 8  ;;  %v1672_v22 = vsel %vm1640_vm4, %v1474_v20, 0.0 }
 0x21a   : > { %v1733_v33 = vsel %vm380_vm2, %v1671_v52, 0.0  ;;  %v1735_v58 = vsel %vm380_vm2, %v1672_v22, 0.0 }
 0x21b   : > { %v1732_v8 = vadd.f32 %v1731_v19, %v1730_v54  ;;  %v1673_v13 = vsel %vm1641_vm5, %v1475_v18, 0.0 }
 0x21c   : > { %v1737_v51 = vsel %vm380_vm2, %v1673_v13, 0.0 }
 0x21d   : > { %v1734_v0 = vadd.f32 %v1733_v33, %v1732_v8 }
 0x21f   : > { %v1736_v50 = vadd.f32 %v1735_v58, %v1734_v0 }
 0x221   : > { %v1738_v27 = vadd.f32 %v1737_v51, %v1736_v50 }
 0x223   : > { %v1739_v53 = vadd.f32 %v1738_v27, %v1674_v23 }
 0x225   : > { %1740 = vst.msk [vmem:[%s3037_s11] sm:$0xff] %vm380_vm2, %v1739_v53 }
 0x226 PF: > { %s22_s8 = sadd.s32 1, %s2183_s8   ;;  %s3204_s26 = smov %s2167_s27 }
 0x227   : > { %p19_p1 = scmp.ge.s32.totalorder %s22_s8, 4   ;;  %s3205_s27 = smov %s2171_s28 }
 0x228   : > { %s3206_s28 = smov %s2281_s14  ;;  %s3207_s29 = smov %s2179_s30 }
 0x229   : > { %s3208_s30 = smov %s3210_s9  ;;  %21 = sbr.rel (!%p19_p1) target bundleno = 7 (0x7), region = 98 }
 0x22e   :  { %1760 = vsyncpa [#allocation4], 1 }
 0x22f   :  { %1762 = vsyncpa [#allocation4 + $0x1], 1 }

</bundles_post_ra>
